<compile_context>
chip_gen: v7x
topology: tpu7x:2x2x1
jax: 0.10.0
libtpu: 0.0.40
codegen_flags: <defaults>
</compile_context>

<pallas_src>
import functools

import jax
import jax.numpy as jnp
from jax.experimental import pallas as pl
from jax.experimental.pallas import tpu as pltpu


def _round_up(n, m):
    return (n + m - 1) // m * m


def _pick_bsub(n):
    """Images packed per grid step.

    Amortizes per-grid-step pipeline overhead while keeping >= 2 grid steps so
    both v7x TensorCores still get work (on v5e/v6e the grid is just a loop).
    """
    if n <= 1:
        return 1
    best = 1
    for cand in range(1, min(8, n // 2) + 1):
        if n % cand == 0:
            best = cand
    return best


def _build_patches(x, patch_ref, c, b_sub, H, W, wrap_l, wrap_r):
    """Write the 9 circular-shift taps of x into patch_ref (bf16).

    x         : (b_sub*c, H*W) f32, flattened row-major per image (idx=h*W+w).
    patch_ref : bf16 VMEM ref; rows [(b*9+t)*c, (b*9+t+1)*c) receive tap
                t = kh*3 + kw of image b:
                  tap[h*W+w] = x_b[((h+kh-1) mod H)*W + ((w+kw-1) mod W)]
                (cross-correlation with circular 'same' padding).
    wrap_l/wrap_r : (1, H*W) bool lane masks (col==0 / col==W-1), hoisted by
                the caller and reused for every layer.
    """
    HW = H * W
    # Horizontal (w) shifts: flat roll + per-row wrap fix-up column.  Rolls
    # stay in f32 (safe XLU lane-rotate path); the bf16 cast happens at the
    # patch store so store bytes / scratch are still halved.
    x_left = jnp.where(wrap_l,                              # dw = -1
                       pltpu.roll(x, HW - W + 1, axis=1),
                       pltpu.roll(x, 1, axis=1))
    x_right = jnp.where(wrap_r,                             # dw = +1
                        pltpu.roll(x, W - 1, axis=1),
                        pltpu.roll(x, HW - 1, axis=1))
    base = (x_left, x, x_right)                             # kw = 0, 1, 2
    for kh in range(3):
        dhp = kh - 1
        for kw in range(3):
            bsrc = base[kw]
            # Vertical (h) shift is an exact flat roll by +-W.
            tap = bsrc if dhp == 0 else pltpu.roll(bsrc, (-dhp * W) % HW, axis=1)
            tap = tap.astype(patch_ref.dtype)
            t = kh * 3 + kw
            for b in range(b_sub):
                patch_ref[(b * 9 + t) * c:(b * 9 + t + 1) * c, :] = \
                    tap[b * c:(b + 1) * c, :]


def _conv_layer(patch_ref, w, bias, c_in, b_sub, relu):
    """One conv layer over b_sub packed images; weights stay stationary."""
    outs = []
    for b in range(b_sub):
        p = patch_ref[b * 9 * c_in:(b + 1) * 9 * c_in, :]
        y = jnp.dot(w, p, preferred_element_type=jnp.float32) + bias
        if relu:
            y = jnp.maximum(y, 0.0)
        outs.append(y)
    return outs[0] if b_sub == 1 else jnp.concatenate(outs, axis=0)


def _cnn_fused_kernel(x_ref, w_in_ref, b_in_ref, w_h_ref, b_h_ref,
                      w_out_ref, b_out_ref, o_ref, patch_ref,
                      *, H, W, b_sub, c_in_p, c_hid_p, c_out_p, n_hidden):
    # x_ref     : (b_sub*c_in_p, HW)  f32, packed batch block (NCHW flattened)
    # w_in_ref  : (c_hid_p, 9*c_in_p) bf16
    # w_h_ref   : (n_h_blk, c_hid_p, 9*c_hid_p) bf16
    # w_out_ref : (c_out_p, 9*c_hid_p) bf16
    # biases    : (*, 1) f32 column vectors (broadcast along lanes)
    # o_ref     : (b_sub*c_out_p, HW) f32
    # patch_ref : bf16 VMEM scratch (b_sub*9*max(c_in_p, c_hid_p), HW)
    HW = H * W

    # Hoisted circular-wrap lane masks, reused by every layer's patch build.
    col = jax.lax.broadcasted_iota(jnp.int32, (1, HW), 1) % W
    wrap_l = col == 0
    wrap_r = col == (W - 1)

    # ---- input layer: conv3x3 (circular) + ReLU ----
    _build_patches(x_ref[...], patch_ref, c_in_p, b_sub, H, W, wrap_l, wrap_r)
    h = _conv_layer(patch_ref, w_in_ref[...], b_in_ref[...],
                    c_in_p, b_sub, relu=True)

    # ---- hidden layers: conv3x3 (circular) + ReLU ----
    # TODO(synk): for large n_hidden switch to lax.fori_loop with dynamic
    # w_h_ref[l] indexing + per-layer weight double-buffering.
    for l in range(n_hidden):
        _build_patches(h, patch_ref, c_hid_p, b_sub, H, W, wrap_l, wrap_r)
        h = _conv_layer(patch_ref, w_h_ref[l], b_h_ref[l],
                        c_hid_p, b_sub, relu=True)

    # ---- output layer: conv3x3 (circular), no activation ----
    _build_patches(h, patch_ref, c_hid_p, b_sub, H, W, wrap_l, wrap_r)
    w_out = w_out_ref[...]
    b_out = b_out_ref[...]
    for b in range(b_sub):
        p = patch_ref[b * 9 * c_hid_p:(b + 1) * 9 * c_hid_p, :]
        y = jnp.dot(w_out, p, preferred_element_type=jnp.float32) + b_out
        o_ref[b * c_out_p:(b + 1) * c_out_p, :] = y.astype(o_ref.dtype)


def _to_mat(w_oihw, cin_p):
    """(Cout, Cin, 3, 3) PyTorch conv weight -> (Cout, 9*cin_p), tap-major."""
    co, ci, kh, kw = w_oihw.shape
    w = jnp.transpose(w_oihw, (0, 2, 3, 1))                 # (co, kh, kw, ci)
    if cin_p != ci:
        w = jnp.pad(w, ((0, 0), (0, 0), (0, 0), (0, cin_p - ci)))
    return w.reshape(co, kh * kw * cin_p)


def cnn_forward(x_nchw, params):
    """Fused CNN forward. params = [(w, b), ...] in PyTorch Conv2d layout
    (w: (Cout, Cin, 3, 3), b: (Cout,)); first = input layer, last = output
    layer, middle = hidden layers (>= 0)."""
    N, c_in, H, W = x_nchw.shape
    HW = H * W
    (w_in, b_in) = params[0]
    hidden = list(params[1:-1])
    (w_out, b_out) = params[-1]
    n_hidden = len(hidden)
    c_hid = w_in.shape[0]
    c_out = w_out.shape[0]

    CH = 16                                    # bf16-friendly sublane alignment
    c_in_p = _round_up(c_in, CH)
    c_hid_p = _round_up(c_hid, CH)
    c_out_p = _round_up(c_out, 8)              # f32 output: 8-sublane alignment

    b_sub = _pick_bsub(N)
    grid_n = N // b_sub

    # NCHW -> (N*C, HW) f32 slab; zero-pad channels for aligned sublane slices.
    x_flat = x_nchw.reshape(N, c_in, HW).astype(jnp.float32)
    if c_in_p != c_in:
        x_flat = jnp.pad(x_flat, ((0, 0), (0, c_in_p - c_in), (0, 0)))
    x_flat = x_flat.reshape(N * c_in_p, HW)

    def prep(w, b, cin_p, cout_p):
        wm = _to_mat(w.astype(jnp.float32), cin_p)
        bm = b.reshape(-1, 1).astype(jnp.float32)
        if cout_p != wm.shape[0]:
            wm = jnp.pad(wm, ((0, cout_p - wm.shape[0]), (0, 0)))
            bm = jnp.pad(bm, ((0, cout_p - bm.shape[0]), (0, 0)))
        return wm.astype(jnp.bfloat16), bm     # bf16 weights, f32 bias

    w_in_m, b_in_m = prep(w_in, b_in, c_in_p, c_hid_p)
    if n_hidden > 0:
        hid = [prep(w, b, c_hid_p, c_hid_p) for (w, b) in hidden]
        w_h_m = jnp.stack([w for (w, _) in hid])
        b_h_m = jnp.stack([b for (_, b) in hid])
    else:
        w_h_m = jnp.zeros((1, c_hid_p, 9 * c_hid_p), jnp.bfloat16)
        b_h_m = jnp.zeros((1, c_hid_p, 1), jnp.float32)
    n_h_blk = w_h_m.shape[0]
    w_out_m, b_out_m = prep(w_out, b_out, c_hid_p, c_out_p)

    n_patch_rows = b_sub * 9 * max(c_in_p, c_hid_p)

    kernel = functools.partial(
        _cnn_fused_kernel, H=H, W=W, b_sub=b_sub,
        c_in_p=c_in_p, c_hid_p=c_hid_p, c_out_p=c_out_p, n_hidden=n_hidden)

    # --- VMEM budget (per grid step) ---
    vmem_est = (
        n_patch_rows * HW * 2                                  # bf16 patch scratch
        + 2 * b_sub * c_in_p * HW * 4                          # input block (dbl-buf)
        + 2 * b_sub * c_out_p * HW * 4                         # output block (dbl-buf)
        + 2 * (w_in_m.size + w_h_m.size + w_out_m.size) * 2    # bf16 weights
        + 2 * (b_in_m.size + b_h_m.size + b_out_m.size) * 4    # f32 biases
        + 6 * b_sub * c_hid_p * HW * 4                         # live f32 act/roll temps
    )
    compiler_kwargs = {"dimension_semantics": ("parallel",)}
    if vmem_est > 32 * 1024 * 1024:
        # Keep headroom under v7x's 64 MiB physical VMEM.
        # TODO(synk): configs beyond this need H*W tiling with a 1-row halo.
        compiler_kwargs["vmem_limit_bytes"] = min(int(vmem_est * 5 // 4),
                                                  56 * 1024 * 1024)

    out = pl.pallas_call(
        kernel,
        out_shape=jax.ShapeDtypeStruct((N * c_out_p, HW), jnp.float32),
        grid_spec=pltpu.PrefetchScalarGridSpec(
            num_scalar_prefetch=0,
            grid=(grid_n,),
            in_specs=[
                pl.BlockSpec((b_sub * c_in_p, HW), lambda n: (n, 0)),
                pl.BlockSpec((c_hid_p, 9 * c_in_p), lambda n: (0, 0)),
                pl.BlockSpec((c_hid_p, 1), lambda n: (0, 0)),
                pl.BlockSpec((n_h_blk, c_hid_p, 9 * c_hid_p),
                             lambda n: (0, 0, 0)),
                pl.BlockSpec((n_h_blk, c_hid_p, 1), lambda n: (0, 0, 0)),
                pl.BlockSpec((c_out_p, 9 * c_hid_p), lambda n: (0, 0)),
                pl.BlockSpec((c_out_p, 1), lambda n: (0, 0)),
            ],
            out_specs=pl.BlockSpec((b_sub * c_out_p, HW), lambda n: (n, 0)),
            scratch_shapes=[pltpu.VMEM((n_patch_rows, HW), jnp.bfloat16)],
        ),
        compiler_params=pltpu.CompilerParams(**compiler_kwargs),
    )(x_flat, w_in_m, b_in_m, w_h_m, b_h_m, w_out_m, b_out_m)

    out = out.reshape(N, c_out_p, HW)[:, :c_out, :]
    return out.reshape(N, c_out, H, W)


def init_cnn_params(key, input_size, output_size, hidden_layers,
                    hidden_channels, kernel_size=3):
    """Deterministic init; weights stored in PyTorch Conv2d layout
    (Cout, Cin, KH, KW), biases (Cout,)."""
    params = []
    dims = [(input_size, hidden_channels)]
    dims += [(hidden_channels, hidden_channels)] * hidden_layers
    dims += [(hidden_channels, output_size)]
    for (cin, cout) in dims:
        key, kw_, kb_ = jax.random.split(key, 3)
        fan_in = cin * kernel_size * kernel_size
        bound = 1.0 / jnp.sqrt(fan_in)
        w = jax.random.uniform(kw_, (cout, cin, kernel_size, kernel_size),
                               minval=-bound, maxval=bound, dtype=jnp.float32)
        b = jax.random.uniform(kb_, (cout,), minval=-bound, maxval=bound,
                               dtype=jnp.float32)
        params.append((w, b))
    return params


def cnn_forward_reference(x_nchw, params):
    """Pure-JAX reference (circular-pad 'same' conv, cross-correlation)."""
    def conv(x, w, b):
        xp = jnp.pad(x, ((0, 0), (0, 0), (1, 1), (1, 1)), mode="wrap")
        y = jax.lax.conv_general_dilated(
            xp, w, window_strides=(1, 1), padding="VALID",
            dimension_numbers=("NCHW", "OIHW", "NCHW"))
        return y + b[None, :, None, None]
    n = len(params)
    x = x_nchw
    for i, (w, b) in enumerate(params):
        x = conv(x, w, b)
        if i < n - 1:
            x = jax.nn.relu(x)
    return x


if __name__ == "__main__":
    key = jax.random.PRNGKey(0)
    k_in, k_params = jax.random.split(key)

    # batch=2, input channels=4, output channels=3, spatial 16x16,
    # hidden_layers=1, hidden_channels=32, kernel 3x3, circular 'same' pad.
    N, Cin, H, W = 2, 4, 16, 16
    Cout, hidden_layers, hidden_channels = 3, 1, 32

    x = jax.random.normal(k_in, (N, Cin, H, W), dtype=jnp.float32)
    params = init_cnn_params(k_params, Cin, Cout, hidden_layers, hidden_channels)

    out = jax.block_until_ready(jax.jit(cnn_forward)(x, params))
    assert out.shape == (N, Cout, H, W), out.shape

    ref = jax.block_until_ready(cnn_forward_reference(x, params))
    max_err = float(jnp.max(jnp.abs(out - ref)))
    assert max_err < 5e-2, f"max abs error vs reference: {max_err}"
    print("KERNEL_OK")
</pallas_src>

<mosaic_0001>
module attributes {stable_mosaic.version = 11 : i64} {
  func.func @_cnn_fused_kernel(%arg0: i32, %arg1: memref<16x256xf32, #tpu.memory_space<vmem>>, %arg2: memref<32x144xbf16, #tpu.memory_space<vmem>>, %arg3: memref<32x1xf32, #tpu.memory_space<vmem>>, %arg4: memref<1x32x288xbf16, #tpu.memory_space<vmem>>, %arg5: memref<1x32x1xf32, #tpu.memory_space<vmem>>, %arg6: memref<8x288xbf16, #tpu.memory_space<vmem>>, %arg7: memref<8x1xf32, #tpu.memory_space<vmem>>, %arg8: memref<8x256xf32, #tpu.memory_space<vmem>>, %arg9: memref<288x256xbf16, #tpu.memory_space<vmem>>) attributes {dimension_semantics = [#tpu.dimension_semantics<parallel>], iteration_bounds = array<i64: 2>, scalar_prefetch = 0 : i64, scratch_operands = 1 : i64, tpu.core_type = #tpu.core_type<tc>, window_params = [{transform_indices = @transform_0, window_bounds = array<i64: 16, 256>}, {pipeline_mode = #tpu.pipeline_mode<synchronous>, transform_indices = @transform_1, window_bounds = array<i64: 32, 144>}, {pipeline_mode = #tpu.pipeline_mode<synchronous>, transform_indices = @transform_2, window_bounds = array<i64: 32, 1>}, {pipeline_mode = #tpu.pipeline_mode<synchronous>, transform_indices = @transform_3, window_bounds = array<i64: 1, 32, 288>}, {pipeline_mode = #tpu.pipeline_mode<synchronous>, transform_indices = @transform_4, window_bounds = array<i64: 1, 32, 1>}, {pipeline_mode = #tpu.pipeline_mode<synchronous>, transform_indices = @transform_5, window_bounds = array<i64: 8, 288>}, {pipeline_mode = #tpu.pipeline_mode<synchronous>, transform_indices = @transform_6, window_bounds = array<i64: 8, 1>}, {transform_indices = @transform_7, window_bounds = array<i64: 8, 256>}]} {
    %0 = tpu.iota {dimensions = array<i32: 1>} : vector<1x256xi32>
    %c16_i32 = arith.constant 16 : i32
    %c0_i32 = arith.constant 0 : i32
    %1 = arith.cmpi eq, %c16_i32, %c0_i32 : i32
    %c1_i32 = arith.constant 1 : i32
    %2 = arith.select %1, %c1_i32, %c16_i32 : i32
    %3 = vector.broadcast %2 : i32 to vector<1x256xi32>
    %4 = arith.remsi %0, %3 : vector<1x256xi32>
    %c0_i32_0 = arith.constant 0 : i32
    %5 = vector.broadcast %c0_i32_0 : i32 to vector<1x256xi32>
    %6 = arith.cmpi ne, %4, %5 : vector<1x256xi32>
    %c0_i32_1 = arith.constant 0 : i32
    %7 = vector.broadcast %c0_i32_1 : i32 to vector<1x256xi32>
    %8 = arith.cmpi slt, %4, %7 : vector<1x256xi32>
    %c0_i32_2 = arith.constant 0 : i32
    %9 = arith.cmpi slt, %2, %c0_i32_2 : i32
    %10 = vector.broadcast %9 : i1 to vector<1x256xi1>
    %11 = vector.broadcast %10 : vector<1x256xi1> to vector<1x256xi1>
    %12 = arith.xori %8, %11 : vector<1x256xi1>
    %13 = arith.andi %12, %6 : vector<1x256xi1>
    %14 = vector.broadcast %2 : i32 to vector<1x256xi32>
    %15 = arith.addi %4, %14 : vector<1x256xi32>
    %16 = arith.select %13, %15, %4 : vector<1x256xi1>, vector<1x256xi32>
    %c0_i32_3 = arith.constant 0 : i32
    %17 = vector.broadcast %c0_i32_3 : i32 to vector<1x256xi32>
    %18 = arith.cmpi eq, %16, %17 : vector<1x256xi32>
    %c15_i32 = arith.constant 15 : i32
    %19 = vector.broadcast %c15_i32 : i32 to vector<1x256xi32>
    %20 = arith.cmpi eq, %16, %19 : vector<1x256xi32>
    %c0 = arith.constant 0 : index
    %c0_4 = arith.constant 0 : index
    %21 = vector.load %arg1[%c0, %c0_4] : memref<16x256xf32, #tpu.memory_space<vmem>>, vector<16x256xf32>
    %c241_i32 = arith.constant 241 : i32
    %22 = tpu.dynamic_rotate %21 by %c241_i32 dim 1 : vector<16x256xf32>, i32 -> vector<16x256xf32>
    %c1_i32_5 = arith.constant 1 : i32
    %23 = tpu.dynamic_rotate %21 by %c1_i32_5 dim 1 : vector<16x256xf32>, i32 -> vector<16x256xf32>
    %24 = vector.shape_cast %18 : vector<1x256xi1> to vector<1x256xi1>
    %25 = vector.broadcast %24 : vector<1x256xi1> to vector<16x256xi1>
    %26 = arith.select %25, %22, %23 : vector<16x256xi1>, vector<16x256xf32>
    %c15_i32_6 = arith.constant 15 : i32
    %27 = tpu.dynamic_rotate %21 by %c15_i32_6 dim 1 : vector<16x256xf32>, i32 -> vector<16x256xf32>
    %c255_i32 = arith.constant 255 : i32
    %28 = tpu.dynamic_rotate %21 by %c255_i32 dim 1 : vector<16x256xf32>, i32 -> vector<16x256xf32>
    %29 = vector.shape_cast %20 : vector<1x256xi1> to vector<1x256xi1>
    %30 = vector.broadcast %29 : vector<1x256xi1> to vector<16x256xi1>
    %31 = arith.select %30, %27, %28 : vector<16x256xi1>, vector<16x256xf32>
    %c16_i32_7 = arith.constant 16 : i32
    %32 = tpu.dynamic_rotate %26 by %c16_i32_7 dim 1 : vector<16x256xf32>, i32 -> vector<16x256xf32>
    %33 = arith.truncf %32 : vector<16x256xf32> to vector<16x256xbf16>
    %c0_8 = arith.constant 0 : index
    %c0_9 = arith.constant 0 : index
    %34 = vector.load %arg9[%c0_8, %c0_9] : memref<288x256xbf16, #tpu.memory_space<vmem>>, vector<16x256xbf16>
    tpu.vector_store %arg9[%c0_8, %c0_9], %33 {strides = array<i32>} : memref<288x256xbf16, #tpu.memory_space<vmem>>, vector<16x256xbf16>,
    %c16_i32_10 = arith.constant 16 : i32
    %35 = tpu.dynamic_rotate %21 by %c16_i32_10 dim 1 : vector<16x256xf32>, i32 -> vector<16x256xf32>
    %36 = arith.truncf %35 : vector<16x256xf32> to vector<16x256xbf16>
    %c16 = arith.constant 16 : index
    %c0_11 = arith.constant 0 : index
    %37 = vector.load %arg9[%c16, %c0_11] : memref<288x256xbf16, #tpu.memory_space<vmem>>, vector<16x256xbf16>
    tpu.vector_store %arg9[%c16, %c0_11], %36 {strides = array<i32>} : memref<288x256xbf16, #tpu.memory_space<vmem>>, vector<16x256xbf16>,
    %c16_i32_12 = arith.constant 16 : i32
    %38 = tpu.dynamic_rotate %31 by %c16_i32_12 dim 1 : vector<16x256xf32>, i32 -> vector<16x256xf32>
    %39 = arith.truncf %38 : vector<16x256xf32> to vector<16x256xbf16>
    %c32 = arith.constant 32 : index
    %c0_13 = arith.constant 0 : index
    %40 = vector.load %arg9[%c32, %c0_13] : memref<288x256xbf16, #tpu.memory_space<vmem>>, vector<16x256xbf16>
    tpu.vector_store %arg9[%c32, %c0_13], %39 {strides = array<i32>} : memref<288x256xbf16, #tpu.memory_space<vmem>>, vector<16x256xbf16>,
    %41 = arith.truncf %26 : vector<16x256xf32> to vector<16x256xbf16>
    %c48 = arith.constant 48 : index
    %c0_14 = arith.constant 0 : index
    %42 = vector.load %arg9[%c48, %c0_14] : memref<288x256xbf16, #tpu.memory_space<vmem>>, vector<16x256xbf16>
    tpu.vector_store %arg9[%c48, %c0_14], %41 {strides = array<i32>} : memref<288x256xbf16, #tpu.memory_space<vmem>>, vector<16x256xbf16>,
    %43 = arith.truncf %21 : vector<16x256xf32> to vector<16x256xbf16>
    %c64 = arith.constant 64 : index
    %c0_15 = arith.constant 0 : index
    %44 = vector.load %arg9[%c64, %c0_15] : memref<288x256xbf16, #tpu.memory_space<vmem>>, vector<16x256xbf16>
    tpu.vector_store %arg9[%c64, %c0_15], %43 {strides = array<i32>} : memref<288x256xbf16, #tpu.memory_space<vmem>>, vector<16x256xbf16>,
    %45 = arith.truncf %31 : vector<16x256xf32> to vector<16x256xbf16>
    %c80 = arith.constant 80 : index
    %c0_16 = arith.constant 0 : index
    %46 = vector.load %arg9[%c80, %c0_16] : memref<288x256xbf16, #tpu.memory_space<vmem>>, vector<16x256xbf16>
    tpu.vector_store %arg9[%c80, %c0_16], %45 {strides = array<i32>} : memref<288x256xbf16, #tpu.memory_space<vmem>>, vector<16x256xbf16>,
    %c240_i32 = arith.constant 240 : i32
    %47 = tpu.dynamic_rotate %26 by %c240_i32 dim 1 : vector<16x256xf32>, i32 -> vector<16x256xf32>
    %48 = arith.truncf %47 : vector<16x256xf32> to vector<16x256xbf16>
    %c96 = arith.constant 96 : index
    %c0_17 = arith.constant 0 : index
    %49 = vector.load %arg9[%c96, %c0_17] : memref<288x256xbf16, #tpu.memory_space<vmem>>, vector<16x256xbf16>
    tpu.vector_store %arg9[%c96, %c0_17], %48 {strides = array<i32>} : memref<288x256xbf16, #tpu.memory_space<vmem>>, vector<16x256xbf16>,
    %c240_i32_18 = arith.constant 240 : i32
    %50 = tpu.dynamic_rotate %21 by %c240_i32_18 dim 1 : vector<16x256xf32>, i32 -> vector<16x256xf32>
    %51 = arith.truncf %50 : vector<16x256xf32> to vector<16x256xbf16>
    %c112 = arith.constant 112 : index
    %c0_19 = arith.constant 0 : index
    %52 = vector.load %arg9[%c112, %c0_19] : memref<288x256xbf16, #tpu.memory_space<vmem>>, vector<16x256xbf16>
    tpu.vector_store %arg9[%c112, %c0_19], %51 {strides = array<i32>} : memref<288x256xbf16, #tpu.memory_space<vmem>>, vector<16x256xbf16>,
    %c240_i32_20 = arith.constant 240 : i32
    %53 = tpu.dynamic_rotate %31 by %c240_i32_20 dim 1 : vector<16x256xf32>, i32 -> vector<16x256xf32>
    %54 = arith.truncf %53 : vector<16x256xf32> to vector<16x256xbf16>
    %c128 = arith.constant 128 : index
    %c0_21 = arith.constant 0 : index
    %55 = vector.load %arg9[%c128, %c0_21] : memref<288x256xbf16, #tpu.memory_space<vmem>>, vector<16x256xbf16>
    tpu.vector_store %arg9[%c128, %c0_21], %54 {strides = array<i32>} : memref<288x256xbf16, #tpu.memory_space<vmem>>, vector<16x256xbf16>,
    %c0_22 = arith.constant 0 : index
    %c0_23 = arith.constant 0 : index
    %56 = vector.load %arg2[%c0_22, %c0_23] : memref<32x144xbf16, #tpu.memory_space<vmem>>, vector<32x144xbf16>
    %c0_24 = arith.constant 0 : index
    %c0_25 = arith.constant 0 : index
    %57 = vector.load %arg3[%c0_24, %c0_25] : memref<32x1xf32, #tpu.memory_space<vmem>>, vector<32x1xf32>
    %c0_26 = arith.constant 0 : index
    %c0_27 = arith.constant 0 : index
    %58 = vector.load %arg9[%c0_26, %c0_27] : memref<288x256xbf16, #tpu.memory_space<vmem>>, vector<144x256xbf16>
    %cst = arith.constant dense<0.000000e+00> : vector<32x256xf32>
    %59 = tpu.matmul %56, %58, %cst {dimension_numbers = #tpu.dot_dimension_numbers<[1], [0], [0], [1], [0, 0, 1, 1], [], []>} : vector<32x144xbf16>, vector<144x256xbf16>, vector<32x256xf32> -> vector<32x256xf32>
    %60 = vector.broadcast %57 : vector<32x1xf32> to vector<32x256xf32>
    %61 = arith.addf %59, %60 : vector<32x256xf32>
    %cst_28 = arith.constant 0.000000e+00 : f32
    %62 = vector.broadcast %cst_28 : f32 to vector<32x256xf32>
    %63 = arith.maximumf %61, %62 : vector<32x256xf32>
    %c241_i32_29 = arith.constant 241 : i32
    %64 = tpu.dynamic_rotate %63 by %c241_i32_29 dim 1 : vector<32x256xf32>, i32 -> vector<32x256xf32>
    %c1_i32_30 = arith.constant 1 : i32
    %65 = tpu.dynamic_rotate %63 by %c1_i32_30 dim 1 : vector<32x256xf32>, i32 -> vector<32x256xf32>
    %66 = vector.shape_cast %18 : vector<1x256xi1> to vector<1x256xi1>
    %67 = vector.broadcast %66 : vector<1x256xi1> to vector<32x256xi1>
    %68 = arith.select %67, %64, %65 : vector<32x256xi1>, vector<32x256xf32>
    %c15_i32_31 = arith.constant 15 : i32
    %69 = tpu.dynamic_rotate %63 by %c15_i32_31 dim 1 : vector<32x256xf32>, i32 -> vector<32x256xf32>
    %c255_i32_32 = arith.constant 255 : i32
    %70 = tpu.dynamic_rotate %63 by %c255_i32_32 dim 1 : vector<32x256xf32>, i32 -> vector<32x256xf32>
    %71 = vector.shape_cast %20 : vector<1x256xi1> to vector<1x256xi1>
    %72 = vector.broadcast %71 : vector<1x256xi1> to vector<32x256xi1>
    %73 = arith.select %72, %69, %70 : vector<32x256xi1>, vector<32x256xf32>
    %c16_i32_33 = arith.constant 16 : i32
    %74 = tpu.dynamic_rotate %68 by %c16_i32_33 dim 1 : vector<32x256xf32>, i32 -> vector<32x256xf32>
    %75 = arith.truncf %74 : vector<32x256xf32> to vector<32x256xbf16>
    %c0_34 = arith.constant 0 : index
    %c0_35 = arith.constant 0 : index
    %76 = vector.load %arg9[%c0_34, %c0_35] : memref<288x256xbf16, #tpu.memory_space<vmem>>, vector<32x256xbf16>
    tpu.vector_store %arg9[%c0_34, %c0_35], %75 {strides = array<i32>} : memref<288x256xbf16, #tpu.memory_space<vmem>>, vector<32x256xbf16>,
    %c16_i32_36 = arith.constant 16 : i32
    %77 = tpu.dynamic_rotate %63 by %c16_i32_36 dim 1 : vector<32x256xf32>, i32 -> vector<32x256xf32>
    %78 = arith.truncf %77 : vector<32x256xf32> to vector<32x256xbf16>
    %c32_37 = arith.constant 32 : index
    %c0_38 = arith.constant 0 : index
    %79 = vector.load %arg9[%c32_37, %c0_38] : memref<288x256xbf16, #tpu.memory_space<vmem>>, vector<32x256xbf16>
    tpu.vector_store %arg9[%c32_37, %c0_38], %78 {strides = array<i32>} : memref<288x256xbf16, #tpu.memory_space<vmem>>, vector<32x256xbf16>,
    %c16_i32_39 = arith.constant 16 : i32
    %80 = tpu.dynamic_rotate %73 by %c16_i32_39 dim 1 : vector<32x256xf32>, i32 -> vector<32x256xf32>
    %81 = arith.truncf %80 : vector<32x256xf32> to vector<32x256xbf16>
    %c64_40 = arith.constant 64 : index
    %c0_41 = arith.constant 0 : index
    %82 = vector.load %arg9[%c64_40, %c0_41] : memref<288x256xbf16, #tpu.memory_space<vmem>>, vector<32x256xbf16>
    tpu.vector_store %arg9[%c64_40, %c0_41], %81 {strides = array<i32>} : memref<288x256xbf16, #tpu.memory_space<vmem>>, vector<32x256xbf16>,
    %83 = arith.truncf %68 : vector<32x256xf32> to vector<32x256xbf16>
    %c96_42 = arith.constant 96 : index
    %c0_43 = arith.constant 0 : index
    %84 = vector.load %arg9[%c96_42, %c0_43] : memref<288x256xbf16, #tpu.memory_space<vmem>>, vector<32x256xbf16>
    tpu.vector_store %arg9[%c96_42, %c0_43], %83 {strides = array<i32>} : memref<288x256xbf16, #tpu.memory_space<vmem>>, vector<32x256xbf16>,
    %85 = arith.truncf %63 : vector<32x256xf32> to vector<32x256xbf16>
    %c128_44 = arith.constant 128 : index
    %c0_45 = arith.constant 0 : index
    %86 = vector.load %arg9[%c128_44, %c0_45] : memref<288x256xbf16, #tpu.memory_space<vmem>>, vector<32x256xbf16>
    tpu.vector_store %arg9[%c128_44, %c0_45], %85 {strides = array<i32>} : memref<288x256xbf16, #tpu.memory_space<vmem>>, vector<32x256xbf16>,
    %87 = arith.truncf %73 : vector<32x256xf32> to vector<32x256xbf16>
    %c160 = arith.constant 160 : index
    %c0_46 = arith.constant 0 : index
    %88 = vector.load %arg9[%c160, %c0_46] : memref<288x256xbf16, #tpu.memory_space<vmem>>, vector<32x256xbf16>
    tpu.vector_store %arg9[%c160, %c0_46], %87 {strides = array<i32>} : memref<288x256xbf16, #tpu.memory_space<vmem>>, vector<32x256xbf16>,
    %c240_i32_47 = arith.constant 240 : i32
    %89 = tpu.dynamic_rotate %68 by %c240_i32_47 dim 1 : vector<32x256xf32>, i32 -> vector<32x256xf32>
    %90 = arith.truncf %89 : vector<32x256xf32> to vector<32x256xbf16>
    %c192 = arith.constant 192 : index
    %c0_48 = arith.constant 0 : index
    %91 = vector.load %arg9[%c192, %c0_48] : memref<288x256xbf16, #tpu.memory_space<vmem>>, vector<32x256xbf16>
    tpu.vector_store %arg9[%c192, %c0_48], %90 {strides = array<i32>} : memref<288x256xbf16, #tpu.memory_space<vmem>>, vector<32x256xbf16>,
    %c240_i32_49 = arith.constant 240 : i32
    %92 = tpu.dynamic_rotate %63 by %c240_i32_49 dim 1 : vector<32x256xf32>, i32 -> vector<32x256xf32>
    %93 = arith.truncf %92 : vector<32x256xf32> to vector<32x256xbf16>
    %c224 = arith.constant 224 : index
    %c0_50 = arith.constant 0 : index
    %94 = vector.load %arg9[%c224, %c0_50] : memref<288x256xbf16, #tpu.memory_space<vmem>>, vector<32x256xbf16>
    tpu.vector_store %arg9[%c224, %c0_50], %93 {strides = array<i32>} : memref<288x256xbf16, #tpu.memory_space<vmem>>, vector<32x256xbf16>,
    %c240_i32_51 = arith.constant 240 : i32
    %95 = tpu.dynamic_rotate %73 by %c240_i32_51 dim 1 : vector<32x256xf32>, i32 -> vector<32x256xf32>
    %96 = arith.truncf %95 : vector<32x256xf32> to vector<32x256xbf16>
    %c256 = arith.constant 256 : index
    %c0_52 = arith.constant 0 : index
    %97 = vector.load %arg9[%c256, %c0_52] : memref<288x256xbf16, #tpu.memory_space<vmem>>, vector<32x256xbf16>
    tpu.vector_store %arg9[%c256, %c0_52], %96 {strides = array<i32>} : memref<288x256xbf16, #tpu.memory_space<vmem>>, vector<32x256xbf16>,
    %c0_53 = arith.constant 0 : index
    %c0_54 = arith.constant 0 : index
    %c0_55 = arith.constant 0 : index
    %98 = vector.load %arg4[%c0_53, %c0_54, %c0_55] : memref<1x32x288xbf16, #tpu.memory_space<vmem>>, vector<1x32x288xbf16>
    %99 = vector.shape_cast %98 : vector<1x32x288xbf16> to vector<32x288xbf16>
    %c0_56 = arith.constant 0 : index
    %c0_57 = arith.constant 0 : index
    %c0_58 = arith.constant 0 : index
    %100 = vector.load %arg5[%c0_56, %c0_57, %c0_58] : memref<1x32x1xf32, #tpu.memory_space<vmem>>, vector<1x32x1xf32>
    %101 = vector.shape_cast %100 : vector<1x32x1xf32> to vector<32x1xf32>
    %c0_59 = arith.constant 0 : index
    %c0_60 = arith.constant 0 : index
    %102 = vector.load %arg9[%c0_59, %c0_60] : memref<288x256xbf16, #tpu.memory_space<vmem>>, vector<288x256xbf16>
    %cst_61 = arith.constant dense<0.000000e+00> : vector<32x256xf32>
    %103 = tpu.matmul %99, %102, %cst_61 {dimension_numbers = #tpu.dot_dimension_numbers<[1], [0], [0], [1], [0, 0, 1, 1], [], []>} : vector<32x288xbf16>, vector<288x256xbf16>, vector<32x256xf32> -> vector<32x256xf32>
    %104 = vector.broadcast %101 : vector<32x1xf32> to vector<32x256xf32>
    %105 = arith.addf %103, %104 : vector<32x256xf32>
    %cst_62 = arith.constant 0.000000e+00 : f32
    %106 = vector.broadcast %cst_62 : f32 to vector<32x256xf32>
    %107 = arith.maximumf %105, %106 : vector<32x256xf32>
    %c241_i32_63 = arith.constant 241 : i32
    %108 = tpu.dynamic_rotate %107 by %c241_i32_63 dim 1 : vector<32x256xf32>, i32 -> vector<32x256xf32>
    %c1_i32_64 = arith.constant 1 : i32
    %109 = tpu.dynamic_rotate %107 by %c1_i32_64 dim 1 : vector<32x256xf32>, i32 -> vector<32x256xf32>
    %110 = vector.shape_cast %18 : vector<1x256xi1> to vector<1x256xi1>
    %111 = vector.broadcast %110 : vector<1x256xi1> to vector<32x256xi1>
    %112 = arith.select %111, %108, %109 : vector<32x256xi1>, vector<32x256xf32>
    %c15_i32_65 = arith.constant 15 : i32
    %113 = tpu.dynamic_rotate %107 by %c15_i32_65 dim 1 : vector<32x256xf32>, i32 -> vector<32x256xf32>
    %c255_i32_66 = arith.constant 255 : i32
    %114 = tpu.dynamic_rotate %107 by %c255_i32_66 dim 1 : vector<32x256xf32>, i32 -> vector<32x256xf32>
    %115 = vector.shape_cast %20 : vector<1x256xi1> to vector<1x256xi1>
    %116 = vector.broadcast %115 : vector<1x256xi1> to vector<32x256xi1>
    %117 = arith.select %116, %113, %114 : vector<32x256xi1>, vector<32x256xf32>
    %c16_i32_67 = arith.constant 16 : i32
    %118 = tpu.dynamic_rotate %112 by %c16_i32_67 dim 1 : vector<32x256xf32>, i32 -> vector<32x256xf32>
    %119 = arith.truncf %118 : vector<32x256xf32> to vector<32x256xbf16>
    %c0_68 = arith.constant 0 : index
    %c0_69 = arith.constant 0 : index
    %120 = vector.load %arg9[%c0_68, %c0_69] : memref<288x256xbf16, #tpu.memory_space<vmem>>, vector<32x256xbf16>
    tpu.vector_store %arg9[%c0_68, %c0_69], %119 {strides = array<i32>} : memref<288x256xbf16, #tpu.memory_space<vmem>>, vector<32x256xbf16>,
    %c16_i32_70 = arith.constant 16 : i32
    %121 = tpu.dynamic_rotate %107 by %c16_i32_70 dim 1 : vector<32x256xf32>, i32 -> vector<32x256xf32>
    %122 = arith.truncf %121 : vector<32x256xf32> to vector<32x256xbf16>
    %c32_71 = arith.constant 32 : index
    %c0_72 = arith.constant 0 : index
    %123 = vector.load %arg9[%c32_71, %c0_72] : memref<288x256xbf16, #tpu.memory_space<vmem>>, vector<32x256xbf16>
    tpu.vector_store %arg9[%c32_71, %c0_72], %122 {strides = array<i32>} : memref<288x256xbf16, #tpu.memory_space<vmem>>, vector<32x256xbf16>,
    %c16_i32_73 = arith.constant 16 : i32
    %124 = tpu.dynamic_rotate %117 by %c16_i32_73 dim 1 : vector<32x256xf32>, i32 -> vector<32x256xf32>
    %125 = arith.truncf %124 : vector<32x256xf32> to vector<32x256xbf16>
    %c64_74 = arith.constant 64 : index
    %c0_75 = arith.constant 0 : index
    %126 = vector.load %arg9[%c64_74, %c0_75] : memref<288x256xbf16, #tpu.memory_space<vmem>>, vector<32x256xbf16>
    tpu.vector_store %arg9[%c64_74, %c0_75], %125 {strides = array<i32>} : memref<288x256xbf16, #tpu.memory_space<vmem>>, vector<32x256xbf16>,
    %127 = arith.truncf %112 : vector<32x256xf32> to vector<32x256xbf16>
    %c96_76 = arith.constant 96 : index
    %c0_77 = arith.constant 0 : index
    %128 = vector.load %arg9[%c96_76, %c0_77] : memref<288x256xbf16, #tpu.memory_space<vmem>>, vector<32x256xbf16>
    tpu.vector_store %arg9[%c96_76, %c0_77], %127 {strides = array<i32>} : memref<288x256xbf16, #tpu.memory_space<vmem>>, vector<32x256xbf16>,
    %129 = arith.truncf %107 : vector<32x256xf32> to vector<32x256xbf16>
    %c128_78 = arith.constant 128 : index
    %c0_79 = arith.constant 0 : index
    %130 = vector.load %arg9[%c128_78, %c0_79] : memref<288x256xbf16, #tpu.memory_space<vmem>>, vector<32x256xbf16>
    tpu.vector_store %arg9[%c128_78, %c0_79], %129 {strides = array<i32>} : memref<288x256xbf16, #tpu.memory_space<vmem>>, vector<32x256xbf16>,
    %131 = arith.truncf %117 : vector<32x256xf32> to vector<32x256xbf16>
    %c160_80 = arith.constant 160 : index
    %c0_81 = arith.constant 0 : index
    %132 = vector.load %arg9[%c160_80, %c0_81] : memref<288x256xbf16, #tpu.memory_space<vmem>>, vector<32x256xbf16>
    tpu.vector_store %arg9[%c160_80, %c0_81], %131 {strides = array<i32>} : memref<288x256xbf16, #tpu.memory_space<vmem>>, vector<32x256xbf16>,
    %c240_i32_82 = arith.constant 240 : i32
    %133 = tpu.dynamic_rotate %112 by %c240_i32_82 dim 1 : vector<32x256xf32>, i32 -> vector<32x256xf32>
    %134 = arith.truncf %133 : vector<32x256xf32> to vector<32x256xbf16>
    %c192_83 = arith.constant 192 : index
    %c0_84 = arith.constant 0 : index
    %135 = vector.load %arg9[%c192_83, %c0_84] : memref<288x256xbf16, #tpu.memory_space<vmem>>, vector<32x256xbf16>
    tpu.vector_store %arg9[%c192_83, %c0_84], %134 {strides = array<i32>} : memref<288x256xbf16, #tpu.memory_space<vmem>>, vector<32x256xbf16>,
    %c240_i32_85 = arith.constant 240 : i32
    %136 = tpu.dynamic_rotate %107 by %c240_i32_85 dim 1 : vector<32x256xf32>, i32 -> vector<32x256xf32>
    %137 = arith.truncf %136 : vector<32x256xf32> to vector<32x256xbf16>
    %c224_86 = arith.constant 224 : index
    %c0_87 = arith.constant 0 : index
    %138 = vector.load %arg9[%c224_86, %c0_87] : memref<288x256xbf16, #tpu.memory_space<vmem>>, vector<32x256xbf16>
    tpu.vector_store %arg9[%c224_86, %c0_87], %137 {strides = array<i32>} : memref<288x256xbf16, #tpu.memory_space<vmem>>, vector<32x256xbf16>,
    %c240_i32_88 = arith.constant 240 : i32
    %139 = tpu.dynamic_rotate %117 by %c240_i32_88 dim 1 : vector<32x256xf32>, i32 -> vector<32x256xf32>
    %140 = arith.truncf %139 : vector<32x256xf32> to vector<32x256xbf16>
    %c256_89 = arith.constant 256 : index
    %c0_90 = arith.constant 0 : index
    %141 = vector.load %arg9[%c256_89, %c0_90] : memref<288x256xbf16, #tpu.memory_space<vmem>>, vector<32x256xbf16>
    tpu.vector_store %arg9[%c256_89, %c0_90], %140 {strides = array<i32>} : memref<288x256xbf16, #tpu.memory_space<vmem>>, vector<32x256xbf16>,
    %c0_91 = arith.constant 0 : index
    %c0_92 = arith.constant 0 : index
    %142 = vector.load %arg6[%c0_91, %c0_92] : memref<8x288xbf16, #tpu.memory_space<vmem>>, vector<8x288xbf16>
    %c0_93 = arith.constant 0 : index
    %c0_94 = arith.constant 0 : index
    %143 = vector.load %arg7[%c0_93, %c0_94] : memref<8x1xf32, #tpu.memory_space<vmem>>, vector<8x1xf32>
    %c0_95 = arith.constant 0 : index
    %c0_96 = arith.constant 0 : index
    %144 = vector.load %arg9[%c0_95, %c0_96] : memref<288x256xbf16, #tpu.memory_space<vmem>>, vector<288x256xbf16>
    %cst_97 = arith.constant dense<0.000000e+00> : vector<8x256xf32>
    %145 = tpu.matmul %142, %144, %cst_97 {dimension_numbers = #tpu.dot_dimension_numbers<[1], [0], [0], [1], [0, 0, 1, 1], [], []>} : vector<8x288xbf16>, vector<288x256xbf16>, vector<8x256xf32> -> vector<8x256xf32>
    %146 = vector.broadcast %143 : vector<8x1xf32> to vector<8x256xf32>
    %147 = arith.addf %145, %146 : vector<8x256xf32>
    %c0_98 = arith.constant 0 : index
    %c0_99 = arith.constant 0 : index
    %148 = vector.load %arg8[%c0_98, %c0_99] : memref<8x256xf32, #tpu.memory_space<vmem>>, vector<8x256xf32>
    tpu.vector_store %arg8[%c0_98, %c0_99], %147 {strides = array<i32>} : memref<8x256xf32, #tpu.memory_space<vmem>>, vector<8x256xf32>,
    return
  }
  func.func @transform_0(%arg0: i32) -> (i32, i32) {
    %c0_i32 = arith.constant 0 : i32
    %c0_i32_0 = arith.constant 0 : i32
    return %arg0, %c0_i32 : i32, i32
  }
  func.func @transform_1(%arg0: i32) -> (i32, i32) {
    %c0_i32 = arith.constant 0 : i32
    %c0_i32_0 = arith.constant 0 : i32
    %c0_i32_1 = arith.constant 0 : i32
    return %c0_i32, %c0_i32_0 : i32, i32
  }
  func.func @transform_2(%arg0: i32) -> (i32, i32) {
    %c0_i32 = arith.constant 0 : i32
    %c0_i32_0 = arith.constant 0 : i32
    %c0_i32_1 = arith.constant 0 : i32
    return %c0_i32, %c0_i32_0 : i32, i32
  }
  func.func @transform_3(%arg0: i32) -> (i32, i32, i32) {
    %c0_i32 = arith.constant 0 : i32
    %c0_i32_0 = arith.constant 0 : i32
    %c0_i32_1 = arith.constant 0 : i32
    %c0_i32_2 = arith.constant 0 : i32
    return %c0_i32, %c0_i32_0, %c0_i32_1 : i32, i32, i32
  }
  func.func @transform_4(%arg0: i32) -> (i32, i32, i32) {
    %c0_i32 = arith.constant 0 : i32
    %c0_i32_0 = arith.constant 0 : i32
    %c0_i32_1 = arith.constant 0 : i32
    %c0_i32_2 = arith.constant 0 : i32
    return %c0_i32, %c0_i32_0, %c0_i32_1 : i32, i32, i32
  }
  func.func @transform_5(%arg0: i32) -> (i32, i32) {
    %c0_i32 = arith.constant 0 : i32
    %c0_i32_0 = arith.constant 0 : i32
    %c0_i32_1 = arith.constant 0 : i32
    return %c0_i32, %c0_i32_0 : i32, i32
  }
  func.func @transform_6(%arg0: i32) -> (i32, i32) {
    %c0_i32 = arith.constant 0 : i32
    %c0_i32_0 = arith.constant 0 : i32
    %c0_i32_1 = arith.constant 0 : i32
    return %c0_i32, %c0_i32_0 : i32, i32
  }
  func.func @transform_7(%arg0: i32) -> (i32, i32) {
    %c0_i32 = arith.constant 0 : i32
    %c0_i32_0 = arith.constant 0 : i32
    return %arg0, %c0_i32 : i32, i32
  }
}

</mosaic_0001>

<bundles_post_ra>
// kernel: cnn_forward.1
= control target key start
LH: loop header
LB: loop body
LE: loop exit
PB: predicated region body
PF: predicated region fallthrough
CT: control target
= control target key end

     0   :  { %s2342_s24 = smov 0   ;;  %s3445_s0 = inlined_call_operand.vmem [shape: f32[32,256], index: 0, kind: input, shape index: {}]   ;;  %s3446_s1 = inlined_call_operand.vmem [shape: bf16[32,144], index: 1, kind: input, shape index: {}]   ;;  %s3447_s2 = inlined_call_operand.vmem [shape: f32[32,1], index: 2, kind: input, shape index: {}]   ;;  %s3448_s3 = inlined_call_operand.vmem [shape: bf16[1,32,288], index: 3, kind: input, shape index: {}]   ;;  %s3449_s4 = inlined_call_operand.vmem [shape: f32[1,32,1], index: 4, kind: input, shape index: {}]   ;;  %s3450_s5 = inlined_call_operand.vmem [shape: bf16[8,288], index: 5, kind: input, shape index: {}]   ;;  %s3451_s6 = inlined_call_operand.vmem [shape: f32[8,1], index: 6, kind: input, shape index: {}]   ;;  %s3452_s7 = inlined_call_operand.vmem [shape: f32[16,256], index: 7, kind: output, shape index: {}]  }
   0x1 LB: > { %s2348_s25 = sadd.s32 4294967295, %s2293_s24   ;;  %p1705_p0 = scmp.ge.s32.totalorder %s2293_s24, 1  ;;  %s2293_s24 = sphi %s2342_s24, %s17_s24  }
   0x2   : > { %p239_p1 = scmp.lt.s32.totalorder %s2293_s24, 3 }
   0x4   : > { %p240_p2 = pnand %p1705_p0, %p239_p1 }
   0x5   : > { %s1706_s26 = sshll.u32 (!%p240_p2), %s2348_s25, 1  ;;  %s2295_s8 = smov (!%p240_p2), 1   ;;  %v285_v6 = vlaneseq (!%p240_p2)  ;;  %vm562_vm8 = vcmask (!%p240_p2), 130048   ;;  %vm1056_vm11 = vcmask (!%p240_p2), 261120   ;;  %v1507_v45 = vld [vmem:[%s3451_s6] sm:$0xff] (!%p240_p2) }
   0x6   : > { %243 = sbr.rel (%p240_p2) target bundleno = 1610 (0x64a), region = 48  ;;  %p273_p3 = scmp.lt.s32.totalorder (!%p240_p2), %s1706_s26, 3 }
   0x7   : > { %s2296_s9 = smov (!%p240_p2), 113   ;;  %s2297_s10 = smov (!%p240_p2), 15   ;;  %v2388_v7 = vand.u32 (!%p240_p2), 127, %v285_v6 }
   0x8   : > { %s2298_s11 = smov (!%p240_p2), 127   ;;  %s2299_s12 = smov (!%p240_p2), 16  }
   0x9   : > { %v287_v8 = vadd.s32 (!%p240_p2), 128, %v2388_v7  ;;  %v292_v11 = vand.u32 (!%p240_p2), 15, %v2388_v7  ;;  %vm341_vm0 = vcmp.lt.s32.totalorder (!%p240_p2), %v2388_v7, 1  ;;  %vm328_vm1 = vcmp.lt.s32.totalorder (!%p240_p2), %v2388_v7, 113  ;;  %s2300_s13 = smov (!%p240_p2), 112   ;;  %p279_p4 = scmp.lt.s32.totalorder (!%p240_p2), %s2348_s25, 1 }
   0xa   : > { %vm362_vm2 = vcmp.lt.s32.totalorder (!%p240_p2), %v2388_v7, 15  ;;  %vm375_vm3 = vcmp.lt.s32.totalorder (!%p240_p2), %v2388_v7, 127  ;;  %vm396_vm9 = vcmp.lt.s32.totalorder (!%p240_p2), %v2388_v7, 16  ;;  %vm457_vm10 = vcmp.lt.s32.totalorder (!%p240_p2), %v2388_v7, 112 }
   0xb   : > { %v299_v12 = vand.u32 (!%p240_p2), 15, %v287_v8  ;;  %vm2396_vm4 = vcmp.eq.s32.totalorder (!%p240_p2), %v292_v11, 0  ;;  %vm2442_vm7 = vcmp.eq.s32.totalorder (!%p240_p2), %v292_v11, 15 }
   0xd   : > { %s3462_s26 = smov (!%p273_p3, %s1706_s26), 3  ;;  %vm2400_vm5 = vcmp.eq.s32.totalorder %v299_v12, 0  ;;  %vm2438_vm6 = vcmp.eq.s32.totalorder %v299_v12, 15  ;;  %s3464_s25 = smov (!%p279_p4, %s2348_s25), 1 }
   0xe   : > { %s1731_s27 = sshll.u32 %s3462_s26, 4  ;;  %s1732_s20 = sshll.u32 %s3464_s25, 4 }
   0xf   : > { %s277_s30 = scalar_lea.vmem %s3445_s0, %s1731_s27  ;;  %s283_s23 = scalar_lea.vmem %s3452_s7, %s1732_s20 }
  0x10   : > { %v2356_v0 = vld [vmem:[%s277_s30] sm:$0xff]  ;;  %v2358_v1 = vld [vmem:[%s277_s30 + $0x10] sm:$0xff]  ;;  %v2360_v2 = vld [vmem:[%s277_s30 + $0x8] sm:$0xff] }
  0x11   : > { %v2364_v3 = vpack.i.bf16 %v2358_v1, %v2356_v0  ;;  %v2366_v4 = vld [vmem:[%s277_s30 + $0x18] sm:$0xff] }
  0x12   : > { %v2374_v5 = vpack.i.bf16 %v2366_v4, %v2360_v2 }
  0x13   : > { %1779 = vrot.lane.b32.xlu1 %v2364_v3, %s2295_s8  ;;  %1769 = vrot.lane.b32.xlu0 %v2364_v3, %s2296_s9 }
  0x17   : > { %1784 = vrot.lane.b32.xlu1 %v2374_v5, %s2295_s8  ;;  %1774 = vrot.lane.b32.xlu0 %v2374_v5, %s2296_s9 }
  0x1b   : > { %1794 = vrot.lane.b32.xlu1 %v2374_v5, %s2297_s10  ;;  %1789 = vrot.lane.b32.xlu0 %v2364_v3, %s2297_s10 }
  0x1f   : > { %1804 = vrot.lane.b32.xlu1 %v2374_v5, %s2298_s11  ;;  %1799 = vrot.lane.b32.xlu0 %v2364_v3, %s2298_s11 }
  0x85   : > { %v1780_v9 = vpop.permute.xlu1 %1779  ;;  %v1770_v10 = vpop.permute.xlu0 %1769 }
  0x86   : > { %v1782_v13 = vunpack.i.h.bf16 %v1780_v9  ;;  %v1781_v14 = vunpack.i.l.bf16 %v1780_v9  ;;  %v1772_v22 = vunpack.i.h.bf16 %v1770_v10  ;;  %v1771_v23 = vunpack.i.l.bf16 %v1770_v10 }
  0x89   : > { %v1785_v15 = vpop.permute.xlu1 %1784  ;;  %v1775_v16 = vpop.permute.xlu0 %1774 }
  0x8a   : > { %v1787_v18 = vunpack.i.h.bf16 %v1785_v15  ;;  %v1786_v19 = vunpack.i.l.bf16 %v1785_v15  ;;  %v1777_v20 = vunpack.i.h.bf16 %v1775_v16  ;;  %v1776_v21 = vunpack.i.l.bf16 %v1775_v16  ;;  %v503_v15 = vld [vmem:[%s3447_s2 + $0x8] sm:$0xff]  ;;  %v504_v16 = vld [vmem:[%s3447_s2 + $0x10] sm:$0xff] }
  0x8c   : > { %v342_v25 = vsel %vm341_vm0, %v1781_v14, %v1786_v19  ;;  %v343_v26 = vsel %vm341_vm0, %v1782_v13, %v1787_v18  ;;  %v344_v27 = vsel %vm341_vm0, %v1786_v19, %v1781_v14  ;;  %v345_v28 = vsel %vm341_vm0, %v1787_v18, %v1782_v13  ;;  %v2272_v14 = vld [vmem:[%s3446_s1 + $0x4] ss:$8 sps:$4 sm:$0xff]   ;;  %v505_v18 = vld [vmem:[%s3447_s2 + $0x18] sm:$0xff] }
  0x8d   : > { %v329_v29 = vsel %vm328_vm1, %v1771_v23, %v1776_v21  ;;  %v330_v30 = vsel %vm328_vm1, %v1772_v22, %v1777_v20  ;;  %v331_v31 = vsel %vm328_vm1, %v1776_v21, %v1771_v23  ;;  %v332_v32 = vsel %vm328_vm1, %v1777_v20, %v1772_v22  ;;  %v1795_v33 = vpop.permute.xlu1 %1794  ;;  %v1790_v34 = vpop.permute.xlu0 %1789  ;;  %1715 = vmatprep.mubr.msk.bf16.mxu0 %vm562_vm8, %v2272_v14 }
  0x8e   : > { %v1797_v35 = vunpack.i.h.bf16 %v1795_v33  ;;  %v1796_v36 = vunpack.i.l.bf16 %v1795_v33  ;;  %v1792_v37 = vunpack.i.h.bf16 %v1790_v34  ;;  %v1791_v38 = vunpack.i.l.bf16 %v1790_v34 }
  0x8f   : > { %v2422_v39 = vsel %vm2400_vm5, %v331_v31, %v342_v25  ;;  %v2426_v40 = vsel %vm2400_vm5, %v332_v32, %v343_v26  ;;  %v2430_v41 = vsel %vm2396_vm4, %v329_v29, %v344_v27  ;;  %v2434_v42 = vsel %vm2396_vm4, %v330_v30, %v345_v28 }
  0x90   : > { %v364_v43 = vsel %vm362_vm2, %v1792_v37, %v1797_v35  ;;  %v366_v46 = vsel %vm362_vm2, %v1797_v35, %v1792_v37  ;;  %v363_v47 = vsel %vm362_vm2, %v1791_v38, %v1796_v36  ;;  %v1818_v48 = vpack.i.bf16 %v2426_v40, %v2422_v39 }
  0x91   : > { %v1808_v49 = vpack.i.bf16 %v2434_v42, %v2430_v41  ;;  %v1805_v50 = vpop.permute.xlu1 %1804  ;;  %v1800_v51 = vpop.permute.xlu0 %1799  ;;  %v365_v56 = vsel %vm362_vm2, %v1796_v36, %v1791_v38  ;;  %v438_v57 = vpack.c.bf16 %v2426_v40, %v2422_v39  ;;  %v437_v58 = vpack.c.bf16 %v2434_v42, %v2430_v41 }
  0x92   : > { %v1807_v52 = vunpack.i.h.bf16 %v1805_v50  ;;  %v1806_v53 = vunpack.i.l.bf16 %v1805_v50  ;;  %v1802_v54 = vunpack.i.h.bf16 %v1800_v51  ;;  %v1801_v55 = vunpack.i.l.bf16 %v1800_v51  ;;  %1819 = vrot.lane.b32.xlu1 %v1818_v48, %s2299_s12 }
  0x93   : > { %1809 = vrot.lane.b32.xlu0 %v1808_v49, %s2299_s12 }
  0x94   : > { %v377_v59 = vsel %vm375_vm3, %v1802_v54, %v1807_v52  ;;  %v379_v60 = vsel %vm375_vm3, %v1807_v52, %v1802_v54  ;;  %v376_v61 = vsel %vm375_vm3, %v1801_v55, %v1806_v53  ;;  %v378_v62 = vsel %vm375_vm3, %v1806_v53, %v1801_v55 }
  0x95   : > { %v2472_v63 = vsel %vm2438_vm6, %v363_v47, %v378_v62  ;;  %v2476_v6 = vsel %vm2438_vm6, %v364_v43, %v379_v60  ;;  %v2480_v8 = vsel %vm2442_vm7, %v365_v56, %v376_v61  ;;  %v2484_v9 = vsel %vm2442_vm7, %v366_v46, %v377_v59 }
  0x96   : > { %v1833_v10 = vpack.i.bf16 %v2476_v6, %v2472_v63  ;;  %1824 = vrot.lane.b32.xlu1 %v2374_v5, %s2299_s12  ;;  %v1828_v11 = vpack.i.bf16 %v2484_v9, %v2480_v8  ;;  %v446_v12 = vpack.c.bf16 %v2476_v6, %v2472_v63  ;;  %v445_v13 = vpack.c.bf16 %v2484_v9, %v2480_v8 }
  0x97   : > { %1814 = vrot.lane.b32.xlu0 %v2364_v3, %s2299_s12 }
  0x9a   : > { %1834 = vrot.lane.b32.xlu1 %v1833_v10, %s2299_s12 }
  0x9b   : > { %1829 = vrot.lane.b32.xlu0 %v1828_v11, %s2299_s12 }
  0x9e   : > { %1849 = vrot.lane.b32.xlu1 %v1818_v48, %s2300_s13 }
  0x9f   : > { %1839 = vrot.lane.b32.xlu0 %v1808_v49, %s2300_s13 }
  0xa2   : > { %1854 = vrot.lane.b32.xlu1 %v2374_v5, %s2300_s13  ;;  %v502_v5 = vld [vmem:[%s3447_s2] sm:$0xff] }
  0xa3   : > { %1844 = vrot.lane.b32.xlu0 %v2364_v3, %s2300_s13  ;;  %v2301_v3 = vmov 0  }
  0xa4   : > { %1869 = vset.pattern.permute.xlu1 %v2301_v3  ;;  %1868 = vset.pattern.permute.xlu0 %v2301_v3 }
  0xa6   : > { %1864 = vrot.lane.b32.xlu1 %v1833_v10, %s2300_s13 }
  0xa7   : > { %1859 = vrot.lane.b32.xlu0 %v1828_v11, %s2300_s13 }
  0xaa   : > { %531 = vperm.xlu1 %1869, %v503_v15   ;;  %v442_v15 = vpack.c.bf16 %v2366_v4, %v2360_v2 }
  0xab   : > { %526 = vperm.xlu0 %1868, %v502_v5  }
  0xae   : > { %536 = vperm.xlu1 %1869, %v504_v16  }
  0xaf   : > { %541 = vperm.xlu0 %1868, %v505_v18   ;;  %v441_v18 = vpack.c.bf16 %v2358_v1, %v2356_v0 }
 0x104   : > { %v1820_v19 = vpop.permute.xlu1 %1819 }
 0x105   : > { %v1810_v20 = vpop.permute.xlu0 %1809  ;;  %v1822_v21 = vunpack.i.h.bf16 %v1820_v19  ;;  %v1821_v22 = vunpack.i.l.bf16 %v1820_v19 }
 0x106   : > { %v1812_v23 = vunpack.i.h.bf16 %v1810_v20  ;;  %v1811_v25 = vunpack.i.l.bf16 %v1810_v20 }
 0x108   : > { %v397_v26 = vsel %vm396_vm9, %v1811_v25, %v1821_v22  ;;  %v398_v27 = vsel %vm396_vm9, %v1812_v23, %v1822_v21  ;;  %v399_v28 = vsel %vm396_vm9, %v1821_v22, %v1811_v25  ;;  %v400_v29 = vsel %vm396_vm9, %v1822_v21, %v1812_v23  ;;  %v1825_v30 = vpop.permute.xlu1 %1824 }
 0x109   : > { %v1815_v31 = vpop.permute.xlu0 %1814  ;;  %v402_v32 = vpack.c.bf16 %v398_v27, %v397_v26  ;;  %v401_v33 = vpack.c.bf16 %v400_v29, %v399_v28  ;;  %v1827_v34 = vunpack.i.h.bf16 %v1825_v30  ;;  %v1826_v35 = vunpack.i.l.bf16 %v1825_v30 }
 0x10a   : > { %v1817_v36 = vunpack.i.h.bf16 %v1815_v31  ;;  %v1816_v37 = vunpack.i.l.bf16 %v1815_v31 }
 0x10b   : > { %569 = vmatprep.subr.bf16.mxu0 %v402_v32 }
 0x10c   : > { %570 = vmatpush1.bf16.msra.mxu0 %v401_v33  ;;  %v413_v38 = vsel %vm396_vm9, %v1816_v37, %v1826_v35  ;;  %v414_v43 = vsel %vm396_vm9, %v1817_v36, %v1827_v34  ;;  %v415_v46 = vsel %vm396_vm9, %v1826_v35, %v1816_v37  ;;  %v416_v47 = vsel %vm396_vm9, %v1827_v34, %v1817_v36  ;;  %v1835_v48 = vpop.permute.xlu1 %1834  ;;  %v2270_v36 = vld [vmem:[%s3446_s1] ss:$8 sps:$4 sm:$0xff]   ;;  %v2273_v37 = vld [vmem:[%s3446_s1 + $0x14] ss:$8 sps:$4 sm:$0xff]  }
 0x10d   : > { %v1830_v49 = vpop.permute.xlu0 %1829  ;;  %v418_v50 = vpack.c.bf16 %v414_v43, %v413_v38  ;;  %v417_v51 = vpack.c.bf16 %v416_v47, %v415_v46  ;;  %v1837_v52 = vunpack.i.h.bf16 %v1835_v48  ;;  %v1836_v53 = vunpack.i.l.bf16 %v1835_v48  ;;  %v2275_v38 = vld [vmem:[%s3446_s1 + $0x10] ss:$8 sps:$4 sm:$0xff]  }
 0x10e   : > { %v1832_v54 = vunpack.i.h.bf16 %v1830_v49  ;;  %v1831_v55 = vunpack.i.l.bf16 %v1830_v49 }
 0x10f   : > { %571 = vmatprep.subr.bf16.mxu0 %v418_v50 }
 0x110   : > { %572 = vmatpush1.bf16.msra.mxu0 %v417_v51  ;;  %v429_v56 = vsel %vm396_vm9, %v1831_v55, %v1836_v53  ;;  %v430_v59 = vsel %vm396_vm9, %v1832_v54, %v1837_v52  ;;  %v431_v60 = vsel %vm396_vm9, %v1836_v53, %v1831_v55  ;;  %v432_v61 = vsel %vm396_vm9, %v1837_v52, %v1832_v54  ;;  %v1850_v62 = vpop.permute.xlu1 %1849 }
 0x111   : > { %v1840_v10 = vpop.permute.xlu0 %1839  ;;  %v434_v11 = vpack.c.bf16 %v430_v59, %v429_v56  ;;  %v433_v14 = vpack.c.bf16 %v432_v61, %v431_v60  ;;  %v1852_v19 = vunpack.i.h.bf16 %v1850_v62  ;;  %v1851_v20 = vunpack.i.l.bf16 %v1850_v62 }
 0x112   : > { %v1842_v21 = vunpack.i.h.bf16 %v1840_v10  ;;  %v1841_v22 = vunpack.i.l.bf16 %v1840_v10 }
 0x113   : > { %573 = vmatprep.subr.bf16.mxu0 %v434_v11 }
 0x114   : > { %574 = vmatpush1.bf16.msra.mxu0 %v433_v14  ;;  %v1855_v5 = vpop.permute.xlu1 %1854  ;;  %v460_v4 = vsel %vm457_vm10, %v1851_v20, %v1841_v22  ;;  %v461_v0 = vsel %vm457_vm10, %v1852_v19, %v1842_v21  ;;  %v458_v25 = vsel %vm457_vm10, %v1841_v22, %v1851_v20  ;;  %v459_v26 = vsel %vm457_vm10, %v1842_v21, %v1852_v19 }
 0x115   : > { %575 = vmatprep.subr.bf16.mxu0 %v438_v57  ;;  %v1845_v16 = vpop.permute.xlu0 %1844  ;;  %v1857_v39 = vunpack.i.h.bf16 %v1855_v5  ;;  %v1856_v40 = vunpack.i.l.bf16 %v1855_v5  ;;  %v462_v31 = vpack.c.bf16 %v459_v26, %v458_v25 }
 0x116   : > { %v1847_v57 = vunpack.i.h.bf16 %v1845_v16  ;;  %v1846_v2 = vunpack.i.l.bf16 %v1845_v16 }
 0x118   : > { %576 = vmatpush1.bf16.msra.mxu0 %v437_v58  ;;  %v1865_v1 = vpop.permute.xlu1 %1864  ;;  %v476_v41 = vsel %vm457_vm10, %v1856_v40, %v1846_v2  ;;  %v477_v42 = vsel %vm457_vm10, %v1857_v39, %v1847_v57  ;;  %v463_v58 = vpack.c.bf16 %v461_v0, %v460_v4  ;;  %v474_v6 = vsel %vm457_vm10, %v1846_v2, %v1856_v40 }
 0x119   : > { %577 = vmatprep.subr.bf16.mxu0 %v442_v15  ;;  %v1860_v23 = vpop.permute.xlu0 %1859  ;;  %v1867_v27 = vunpack.i.h.bf16 %v1865_v1  ;;  %v1866_v28 = vunpack.i.l.bf16 %v1865_v1  ;;  %v479_v63 = vpack.c.bf16 %v477_v42, %v476_v41 }
 0x11a   : > { %v1862_v29 = vunpack.i.h.bf16 %v1860_v23  ;;  %v1861_v30 = vunpack.i.l.bf16 %v1860_v23 }
 0x11c   : > { %578 = vmatpush1.bf16.msra.mxu0 %v441_v18  ;;  %v492_v33 = vsel %vm457_vm10, %v1866_v28, %v1861_v30  ;;  %v493_v34 = vsel %vm457_vm10, %v1867_v27, %v1862_v29  ;;  %v490_v9 = vsel %vm457_vm10, %v1861_v30, %v1866_v28 }
 0x11d   : > { %579 = vmatprep.subr.bf16.mxu0 %v446_v12  ;;  %v475_v12 = vsel %vm457_vm10, %v1847_v57, %v1857_v39  ;;  %v495_v8 = vpack.c.bf16 %v493_v34, %v492_v33 }
 0x11e   : > { %v478_v32 = vpack.c.bf16 %v475_v12, %v474_v6 }
 0x120   : > { %580 = vmatpush1.bf16.msra.mxu0 %v445_v13  ;;  %v491_v13 = vsel %vm457_vm10, %v1862_v29, %v1867_v27 }
 0x121   : > { %581 = vmatprep.subr.bf16.mxu0 %v463_v58  ;;  %v494_v35 = vpack.c.bf16 %v491_v13, %v490_v9 }
 0x124   : > { %582 = vmatpush1.bf16.msra.mxu0 %v462_v31 }
 0x125   : > { %583 = vmatprep.subr.bf16.mxu0 %v479_v63 }
 0x128   : > { %584 = vmatpush1.bf16.msra.mxu0 %v478_v32 }
 0x129   : > { %585 = vmatprep.subr.bf16.mxu0 %v495_v8  ;;  %v532_v49 = vpop.permute.xlu1 %531 }
 0x12a   : > { %v527_v43 = vpop.permute.xlu0 %526 }
 0x12c   : > { %586 = vmatpush1.bf16.msra.mxu0 %v494_v35 }
 0x12d   : > { %v537_v62 = vpop.permute.xlu1 %536 }
 0x12e   : > { %v542_v5 = vpop.permute.xlu0 %541 }
 0x12f   : > { %602 = vmatmul.mubr.bf16.vlgmr.msra.gmra.mrb[0].mxu0 %v2270_v36 }
 0x130   : > { %1716 = vmatprep.mubr.msk.bf16.mxu0 %vm562_vm8, %v2273_v37 }
 0x137   : > { %612 = vmatmul.mubr.bf16.gmra.mrb[4].mxu0 %v2275_v38 }
 0x202   : > { %v603_v46 = vpop.f32.mrb[0].mxu0 }
 0x203   : > { %v604_v47 = vadd.f32 %v603_v46, %v527_v43  ;;  %v605_v48 = vpop.f32.mrb[1].mxu0 }
 0x204   : > { %v606_v50 = vadd.f32 %v605_v48, %v527_v43  ;;  %v607_v51 = vpop.f32.mrb[2].mxu0 }
 0x205   : > { %v608_v52 = vadd.f32 %v607_v51, %v532_v49  ;;  %v609_v53 = vpop.f32.mrb[3].mxu0  ;;  %v622_v55 = vmax.f32 %v604_v47, 0.0 }
 0x206   : > { %v610_v54 = vadd.f32 %v609_v53, %v532_v49  ;;  %v623_v59 = vmax.f32 %v606_v50, 0.0 }
 0x207   : > { %v624_v56 = vmax.f32 %v608_v52, 0.0 }
 0x208   : > { %v625_v60 = vmax.f32 %v610_v54, 0.0 }
 0x209   : > { %v2602_v61 = vpack.i.bf16 %v624_v56, %v622_v55  ;;  %v2612_v20 = vpack.c.bf16 %v624_v56, %v622_v55 }
 0x20a   : > { %v613_v10 = vpop.f32.mrb[4].mxu0  ;;  %v2604_v11 = vpack.i.bf16 %v625_v60, %v623_v59  ;;  %v2610_v19 = vpack.c.bf16 %v625_v60, %v623_v59 }
 0x20b   : > { %v614_v14 = vadd.f32 %v613_v10, %v537_v62  ;;  %v615_v15 = vpop.f32.mrb[5].mxu0  ;;  %1871 = vrot.lane.b32.xlu1 %v2602_v61, %s2296_s9 }
 0x20c   : > { %v616_v16 = vadd.f32 %v615_v15, %v537_v62  ;;  %v617_v18 = vpop.f32.mrb[6].mxu0  ;;  %1881 = vrot.lane.b32.xlu0 %v2604_v11, %s2296_s9 }
 0x20d   : > { %v618_v21 = vadd.f32 %v617_v18, %v542_v5  ;;  %v619_v22 = vpop.f32.mrb[7].mxu0  ;;  %v626_v40 = vmax.f32 %v614_v14, 0.0 }
 0x20e   : > { %v620_v39 = vadd.f32 %v619_v22, %v542_v5  ;;  %v627_v2 = vmax.f32 %v616_v16, 0.0 }
 0x20f   : > { %v628_v57 = vmax.f32 %v618_v21, 0.0  ;;  %1876 = vrot.lane.b32.xlu1 %v2602_v61, %s2295_s8 }
 0x210   : > { %v629_v4 = vmax.f32 %v620_v39, 0.0  ;;  %1886 = vrot.lane.b32.xlu0 %v2604_v11, %s2295_s8 }
 0x211   : > { %v2618_v0 = vpack.i.bf16 %v628_v57, %v626_v40  ;;  %v2628_v41 = vpack.c.bf16 %v628_v57, %v626_v40 }
 0x212   : > { %v2620_v1 = vpack.i.bf16 %v629_v4, %v627_v2  ;;  %v2626_v23 = vpack.c.bf16 %v629_v4, %v627_v2 }
 0x213   : > { %1891 = vrot.lane.b32.xlu1 %v2618_v0, %s2296_s9 }
 0x214   : > { %1906 = vrot.lane.b32.xlu0 %v2620_v1, %s2296_s9 }
 0x217   : > { %1896 = vrot.lane.b32.xlu1 %v2618_v0, %s2295_s8 }
 0x218   : > { %1911 = vrot.lane.b32.xlu0 %v2620_v1, %s2295_s8 }
 0x21b   : > { %1901 = vrot.lane.b32.xlu1 %v2602_v61, %s2297_s10 }
 0x21c   : > { %1916 = vrot.lane.b32.xlu0 %v2604_v11, %s2297_s10 }
 0x21f   : > { %1921 = vrot.lane.b32.xlu1 %v2602_v61, %s2298_s11 }
 0x220   : > { %1926 = vrot.lane.b32.xlu0 %v2604_v11, %s2298_s11 }
 0x223   : > { %1931 = vrot.lane.b32.xlu1 %v2618_v0, %s2297_s10 }
 0x224   : > { %1941 = vrot.lane.b32.xlu0 %v2620_v1, %s2297_s10 }
 0x227   : > { %1936 = vrot.lane.b32.xlu1 %v2618_v0, %s2298_s11 }
 0x228   : > { %1946 = vrot.lane.b32.xlu0 %v2620_v1, %s2298_s11 }
 0x27d   : > { %v1872_v42 = vpop.permute.xlu1 %1871 }
 0x27e   : > { %v1882_v58 = vpop.permute.xlu0 %1881  ;;  %v1874_v25 = vunpack.i.h.bf16 %v1872_v42  ;;  %v1873_v26 = vunpack.i.l.bf16 %v1872_v42 }
 0x27f   : > { %v1884_v27 = vunpack.i.h.bf16 %v1882_v58  ;;  %v1883_v28 = vunpack.i.l.bf16 %v1882_v58 }
 0x281   : > { %v1877_v29 = vpop.permute.xlu1 %1876  ;;  %v650_v32 = vsel %vm328_vm1, %v1883_v28, %v1873_v26  ;;  %v651_v33 = vsel %vm328_vm1, %v1884_v27, %v1874_v25  ;;  %v646_v36 = vsel %vm328_vm1, %v1873_v26, %v1883_v28  ;;  %v647_v37 = vsel %vm328_vm1, %v1874_v25, %v1884_v27 }
 0x282   : > { %v1879_v30 = vunpack.i.h.bf16 %v1877_v29  ;;  %v1878_v63 = vunpack.i.l.bf16 %v1877_v29  ;;  %v1887_v6 = vpop.permute.xlu0 %1886 }
 0x283   : > { %v1889_v12 = vunpack.i.h.bf16 %v1887_v6  ;;  %v1888_v31 = vunpack.i.l.bf16 %v1887_v6 }
 0x285   : > { %v670_v34 = vsel %vm341_vm0, %v1878_v63, %v1888_v31  ;;  %v671_v8 = vsel %vm341_vm0, %v1879_v30, %v1889_v12  ;;  %v674_v9 = vsel %vm341_vm0, %v1888_v31, %v1878_v63  ;;  %v675_v13 = vsel %vm341_vm0, %v1889_v12, %v1879_v30  ;;  %v1892_v35 = vpop.permute.xlu1 %1891 }
 0x286   : > { %v1907_v38 = vpop.permute.xlu0 %1906  ;;  %v2668_v43 = vsel %vm2400_vm5, %v650_v32, %v670_v34  ;;  %v2672_v46 = vsel %vm2400_vm5, %v651_v33, %v671_v8  ;;  %v1894_v47 = vunpack.i.h.bf16 %v1892_v35  ;;  %v1893_v48 = vunpack.i.l.bf16 %v1892_v35 }
 0x287   : > { %v2676_v49 = vpack.i.bf16 %v2672_v46, %v2668_v43  ;;  %v2680_v50 = vsel %vm2396_vm4, %v646_v36, %v674_v9  ;;  %v1909_v51 = vunpack.i.h.bf16 %v1907_v38  ;;  %v1908_v52 = vunpack.i.l.bf16 %v1907_v38 }
 0x288   : > { %v2684_v53 = vsel %vm2396_vm4, %v647_v37, %v675_v13  ;;  %v839_v54 = vpack.c.bf16 %v2672_v46, %v2668_v43 }
 0x289   : > { %v1897_v55 = vpop.permute.xlu1 %1896  ;;  %1956 = vrot.lane.b32.xlu0 %v2676_v49, %s2299_s12  ;;  %v2692_v60 = vpack.i.bf16 %v2684_v53, %v2680_v50  ;;  %v838_v15 = vpack.c.bf16 %v2684_v53, %v2680_v50  ;;  %v652_v5 = vsel %vm328_vm1, %v1908_v52, %v1893_v48  ;;  %v653_v16 = vsel %vm328_vm1, %v1909_v51, %v1894_v47 }
 0x28a   : > { %v1899_v56 = vunpack.i.h.bf16 %v1897_v55  ;;  %v1898_v59 = vunpack.i.l.bf16 %v1897_v55  ;;  %v1912_v62 = vpop.permute.xlu0 %1911  ;;  %v648_v57 = vsel %vm328_vm1, %v1893_v48, %v1908_v52  ;;  %v649_v2 = vsel %vm328_vm1, %v1894_v47, %v1909_v51 }
 0x28b   : > { %v1914_v10 = vunpack.i.h.bf16 %v1912_v62  ;;  %v1913_v14 = vunpack.i.l.bf16 %v1912_v62  ;;  %1951 = vrot.lane.b32.xlu1 %v2692_v60, %s2299_s12 }
 0x28d   : > { %v672_v18 = vsel %vm341_vm0, %v1898_v59, %v1913_v14  ;;  %v673_v21 = vsel %vm341_vm0, %v1899_v56, %v1914_v10  ;;  %v676_v22 = vsel %vm341_vm0, %v1913_v14, %v1898_v59  ;;  %v677_v39 = vsel %vm341_vm0, %v1914_v10, %v1899_v56  ;;  %v1902_v40 = vpop.permute.xlu1 %1901 }
 0x28e   : > { %v1917_v4 = vpop.permute.xlu0 %1916  ;;  %v2716_v42 = vsel %vm2400_vm5, %v652_v5, %v672_v18  ;;  %v2720_v58 = vsel %vm2400_vm5, %v653_v16, %v673_v21  ;;  %v1904_v25 = vunpack.i.h.bf16 %v1902_v40  ;;  %v1903_v26 = vunpack.i.l.bf16 %v1902_v40 }
 0x28f   : > { %v2724_v27 = vpack.i.bf16 %v2720_v58, %v2716_v42  ;;  %v2728_v28 = vsel %vm2396_vm4, %v648_v57, %v676_v22  ;;  %v1919_v29 = vunpack.i.h.bf16 %v1917_v4  ;;  %v1918_v30 = vunpack.i.l.bf16 %v1917_v4 }
 0x290   : > { %v2732_v63 = vsel %vm2396_vm4, %v649_v2, %v677_v39  ;;  %v841_v6 = vpack.c.bf16 %v2720_v58, %v2716_v42 }
 0x291   : > { %v1922_v12 = vpop.permute.xlu1 %1921  ;;  %1971 = vrot.lane.b32.xlu0 %v2724_v27, %s2299_s12  ;;  %v1960_v33 = vpack.i.bf16 %v2732_v63, %v2728_v28  ;;  %v840_v13 = vpack.c.bf16 %v2732_v63, %v2728_v28  ;;  %v702_v35 = vsel %vm362_vm2, %v1903_v26, %v1918_v30  ;;  %v703_v36 = vsel %vm362_vm2, %v1904_v25, %v1919_v29 }
 0x292   : > { %v1924_v31 = vunpack.i.h.bf16 %v1922_v12  ;;  %v1923_v32 = vunpack.i.l.bf16 %v1922_v12  ;;  %v1927_v34 = vpop.permute.xlu0 %1926  ;;  %v706_v52 = vsel %vm362_vm2, %v1918_v30, %v1903_v26  ;;  %v707_v62 = vsel %vm362_vm2, %v1919_v29, %v1904_v25 }
 0x293   : > { %v1929_v8 = vunpack.i.h.bf16 %v1927_v34  ;;  %v1928_v9 = vunpack.i.l.bf16 %v1927_v34  ;;  %1961 = vrot.lane.b32.xlu1 %v1960_v33, %s2299_s12 }
 0x295   : > { %v726_v37 = vsel %vm375_vm3, %v1923_v32, %v1928_v9  ;;  %v727_v38 = vsel %vm375_vm3, %v1924_v31, %v1929_v8  ;;  %v730_v47 = vsel %vm375_vm3, %v1928_v9, %v1923_v32  ;;  %v731_v48 = vsel %vm375_vm3, %v1929_v8, %v1924_v31  ;;  %v1932_v51 = vpop.permute.xlu1 %1931  ;;  %1976 = vrot.lane.b32.xlu0 %v2604_v11, %s2299_s12 }
 0x296   : > { %v1942_v55 = vpop.permute.xlu0 %1941  ;;  %v2761_v56 = vsel %vm2438_vm6, %v702_v35, %v730_v47  ;;  %v2765_v59 = vsel %vm2438_vm6, %v703_v36, %v731_v48  ;;  %v1934_v10 = vunpack.i.h.bf16 %v1932_v51  ;;  %v1933_v14 = vunpack.i.l.bf16 %v1932_v51 }
 0x297   : > { %v1943_v5 = vunpack.i.l.bf16 %v1942_v55  ;;  %1966 = vrot.lane.b32.xlu1 %v2602_v61, %s2299_s12  ;;  %v1944_v16 = vunpack.i.h.bf16 %v1942_v55  ;;  %v2773_v18 = vsel %vm2442_vm7, %v706_v52, %v726_v37  ;;  %v2777_v21 = vsel %vm2442_vm7, %v707_v62, %v727_v38 }
 0x298   : > { %v855_v22 = vpack.c.bf16 %v2765_v59, %v2761_v56  ;;  %v1995_v4 = vpack.i.bf16 %v2765_v59, %v2761_v56  ;;  %v854_v30 = vpack.c.bf16 %v2777_v21, %v2773_v18  ;;  %v1990_v34 = vpack.i.bf16 %v2777_v21, %v2773_v18 }
 0x299   : > { %v1937_v39 = vpop.permute.xlu1 %1936  ;;  %1986 = vrot.lane.b32.xlu0 %v2620_v1, %s2299_s12  ;;  %v704_v25 = vsel %vm362_vm2, %v1933_v14, %v1943_v5  ;;  %v705_v12 = vsel %vm362_vm2, %v1934_v10, %v1944_v16  ;;  %v708_v31 = vsel %vm362_vm2, %v1943_v5, %v1933_v14  ;;  %v709_v32 = vsel %vm362_vm2, %v1944_v16, %v1934_v10 }
 0x29a   : > { %v1939_v40 = vunpack.i.h.bf16 %v1937_v39  ;;  %v1938_v57 = vunpack.i.l.bf16 %v1937_v39  ;;  %v1947_v2 = vpop.permute.xlu0 %1946 }
 0x29b   : > { %v1949_v26 = vunpack.i.h.bf16 %v1947_v2  ;;  %v1948_v29 = vunpack.i.l.bf16 %v1947_v2  ;;  %1981 = vrot.lane.b32.xlu1 %v2618_v0, %s2299_s12 }
 0x29d   : > { %v728_v8 = vsel %vm375_vm3, %v1938_v57, %v1948_v29  ;;  %v729_v9 = vsel %vm375_vm3, %v1939_v40, %v1949_v26  ;;  %v732_v35 = vsel %vm375_vm3, %v1948_v29, %v1938_v57  ;;  %v733_v36 = vsel %vm375_vm3, %v1949_v26, %v1939_v40  ;;  %1996 = vrot.lane.b32.xlu0 %v1995_v4, %s2299_s12 }
 0x29e   : > { %v2810_v37 = vsel %vm2438_vm6, %v704_v25, %v732_v35  ;;  %v2814_v38 = vsel %vm2438_vm6, %v705_v12, %v733_v36  ;;  %v2818_v47 = vsel %vm2442_vm7, %v708_v31, %v728_v8  ;;  %v2822_v48 = vsel %vm2442_vm7, %v709_v32, %v729_v9 }
 0x29f   : > { %v2005_v51 = vpack.i.bf16 %v2814_v38, %v2810_v37  ;;  %1991 = vrot.lane.b32.xlu1 %v1990_v34, %s2299_s12  ;;  %v2000_v52 = vpack.i.bf16 %v2822_v48, %v2818_v47  ;;  %v857_v55 = vpack.c.bf16 %v2814_v38, %v2810_v37  ;;  %v856_v62 = vpack.c.bf16 %v2822_v48, %v2818_v47 }
 0x2a1   : > { %2006 = vrot.lane.b32.xlu0 %v2005_v51, %s2299_s12 }
 0x2a3   : > { %2001 = vrot.lane.b32.xlu1 %v2000_v52, %s2299_s12 }
 0x2a5   : > { %2016 = vrot.lane.b32.xlu0 %v2676_v49, %s2300_s13  ;;  %v967_v49 = vld [vmem:[%s3449_s4 + $0x8] sm:$0xff] }
 0x2a7   : > { %2011 = vrot.lane.b32.xlu1 %v2692_v60, %s2300_s13 }
 0x2a9   : > { %2031 = vrot.lane.b32.xlu0 %v2724_v27, %s2300_s13 }
 0x2ab   : > { %2021 = vrot.lane.b32.xlu1 %v1960_v33, %s2300_s13 }
 0x2ad   : > { %2036 = vrot.lane.b32.xlu0 %v2604_v11, %s2300_s13  ;;  %v969_v11 = vld [vmem:[%s3449_s4 + $0x18] sm:$0xff] }
 0x2af   : > { %2026 = vrot.lane.b32.xlu1 %v2602_v61, %s2300_s13  ;;  %v966_v61 = vld [vmem:[%s3449_s4] sm:$0xff] }
 0x2b1   : > { %2046 = vrot.lane.b32.xlu0 %v2620_v1, %s2300_s13  ;;  %v2278_v1 = vld [vmem:[%s3448_s3 + $0x4] ss:$12 sps:$4 sm:$0xff]  }
 0x2b2   : > { %1095 = vmatprep.mubr.bf16.mxu1 %v2278_v1 }
 0x2b3   : > { %2041 = vrot.lane.b32.xlu1 %v2618_v0, %s2300_s13  ;;  %v968_v0 = vld [vmem:[%s3449_s4 + $0x10] sm:$0xff] }
 0x2b5   : > { %2056 = vrot.lane.b32.xlu0 %v1995_v4, %s2300_s13 }
 0x2b7   : > { %2051 = vrot.lane.b32.xlu1 %v1990_v34, %s2300_s13 }
 0x2b9   : > { %2066 = vrot.lane.b32.xlu0 %v2005_v51, %s2300_s13 }
 0x2bb   : > { %2061 = vrot.lane.b32.xlu1 %v2000_v52, %s2300_s13 }
 0x2bd   : > { %1013 = vperm.xlu0 %1868, %v967_v49  }
 0x2bf   : > { %1008 = vperm.xlu1 %1869, %v966_v61  }
 0x2c1   : > { %1023 = vperm.xlu0 %1868, %v969_v11  }
 0x2c3   : > { %1018 = vperm.xlu1 %1869, %v968_v0  }
 0x2fb   : > { %v1957_v60 = vpop.permute.xlu0 %1956 }
 0x2fc   : > { %v1959_v27 = vunpack.i.h.bf16 %v1957_v60  ;;  %v1958_v33 = vunpack.i.l.bf16 %v1957_v60 }
 0x2fd   : > { %v1952_v10 = vpop.permute.xlu1 %1951 }
 0x2fe   : > { %v1954_v14 = vunpack.i.h.bf16 %v1952_v10  ;;  %v1953_v5 = vunpack.i.l.bf16 %v1952_v10 }
 0x300   : > { %v758_v16 = vsel %vm396_vm9, %v1953_v5, %v1958_v33  ;;  %v759_v39 = vsel %vm396_vm9, %v1954_v14, %v1959_v27  ;;  %v762_v40 = vsel %vm396_vm9, %v1958_v33, %v1953_v5  ;;  %v763_v57 = vsel %vm396_vm9, %v1959_v27, %v1954_v14 }
 0x301   : > { %v767_v2 = vpack.c.bf16 %v759_v39, %v758_v16  ;;  %v766_v4 = vpack.c.bf16 %v763_v57, %v762_v40 }
 0x303   : > { %v1972_v25 = vpop.permute.xlu0 %1971  ;;  %1063 = vmatprep.subr.bf16.mxu1 %v767_v2 }
 0x304   : > { %1064 = vmatpush1.bf16.msra.mxu1 %v766_v4  ;;  %v1974_v26 = vunpack.i.h.bf16 %v1972_v25  ;;  %v1973_v29 = vunpack.i.l.bf16 %v1972_v25 }
 0x305   : > { %v1962_v12 = vpop.permute.xlu1 %1961 }
 0x306   : > { %v1964_v31 = vunpack.i.h.bf16 %v1962_v12  ;;  %v1963_v32 = vunpack.i.l.bf16 %v1962_v12 }
 0x307   : > { %v1977_v34 = vpop.permute.xlu0 %1976 }
 0x308   : > { %v1979_v8 = vunpack.i.h.bf16 %v1977_v34  ;;  %v1978_v9 = vunpack.i.l.bf16 %v1977_v34  ;;  %v760_v35 = vsel %vm396_vm9, %v1963_v32, %v1973_v29  ;;  %v761_v36 = vsel %vm396_vm9, %v1964_v31, %v1974_v26 }
 0x309   : > { %v764_v51 = vsel %vm396_vm9, %v1973_v29, %v1963_v32  ;;  %v765_v52 = vsel %vm396_vm9, %v1974_v26, %v1964_v31  ;;  %v1967_v49 = vpop.permute.xlu1 %1966  ;;  %v769_v61 = vpack.c.bf16 %v761_v36, %v760_v35 }
 0x30a   : > { %v768_v11 = vpack.c.bf16 %v765_v52, %v764_v51  ;;  %v1969_v0 = vunpack.i.h.bf16 %v1967_v49  ;;  %v1968_v1 = vunpack.i.l.bf16 %v1967_v49 }
 0x30b   : > { %v1987_v60 = vpop.permute.xlu0 %1986  ;;  %1065 = vmatprep.subr.bf16.mxu1 %v769_v61 }
 0x30c   : > { %v1989_v27 = vunpack.i.h.bf16 %v1987_v60  ;;  %v1988_v33 = vunpack.i.l.bf16 %v1987_v60  ;;  %1066 = vmatpush1.bf16.msra.mxu1 %v768_v11  ;;  %v790_v10 = vsel %vm396_vm9, %v1968_v1, %v1978_v9  ;;  %v791_v14 = vsel %vm396_vm9, %v1969_v0, %v1979_v8 }
 0x30d   : > { %v794_v5 = vsel %vm396_vm9, %v1978_v9, %v1968_v1  ;;  %v795_v16 = vsel %vm396_vm9, %v1979_v8, %v1969_v0  ;;  %v1982_v39 = vpop.permute.xlu1 %1981  ;;  %v799_v40 = vpack.c.bf16 %v791_v14, %v790_v10 }
 0x30e   : > { %v798_v57 = vpack.c.bf16 %v795_v16, %v794_v5  ;;  %v1984_v2 = vunpack.i.h.bf16 %v1982_v39  ;;  %v1983_v4 = vunpack.i.l.bf16 %v1982_v39 }
 0x30f   : > { %v1997_v25 = vpop.permute.xlu0 %1996  ;;  %1067 = vmatprep.subr.bf16.mxu1 %v799_v40 }
 0x310   : > { %v1999_v26 = vunpack.i.h.bf16 %v1997_v25  ;;  %v1998_v29 = vunpack.i.l.bf16 %v1997_v25  ;;  %1068 = vmatpush1.bf16.msra.mxu1 %v798_v57  ;;  %v792_v12 = vsel %vm396_vm9, %v1983_v4, %v1988_v33  ;;  %v793_v31 = vsel %vm396_vm9, %v1984_v2, %v1989_v27 }
 0x311   : > { %v796_v32 = vsel %vm396_vm9, %v1988_v33, %v1983_v4  ;;  %v797_v34 = vsel %vm396_vm9, %v1989_v27, %v1984_v2  ;;  %v1992_v8 = vpop.permute.xlu1 %1991  ;;  %v801_v9 = vpack.c.bf16 %v793_v31, %v792_v12 }
 0x312   : > { %v800_v35 = vpack.c.bf16 %v797_v34, %v796_v32  ;;  %v1994_v36 = vunpack.i.h.bf16 %v1992_v8  ;;  %v1993_v51 = vunpack.i.l.bf16 %v1992_v8 }
 0x313   : > { %v2007_v52 = vpop.permute.xlu0 %2006  ;;  %1069 = vmatprep.subr.bf16.mxu1 %v801_v9 }
 0x314   : > { %v2009_v49 = vunpack.i.h.bf16 %v2007_v52  ;;  %v2008_v61 = vunpack.i.l.bf16 %v2007_v52  ;;  %1070 = vmatpush1.bf16.msra.mxu1 %v800_v35  ;;  %v822_v11 = vsel %vm396_vm9, %v1993_v51, %v1998_v29  ;;  %v823_v0 = vsel %vm396_vm9, %v1994_v36, %v1999_v26 }
 0x315   : > { %v826_v1 = vsel %vm396_vm9, %v1998_v29, %v1993_v51  ;;  %v827_v60 = vsel %vm396_vm9, %v1999_v26, %v1994_v36  ;;  %v2002_v27 = vpop.permute.xlu1 %2001  ;;  %v831_v33 = vpack.c.bf16 %v823_v0, %v822_v11 }
 0x316   : > { %v830_v10 = vpack.c.bf16 %v827_v60, %v826_v1  ;;  %v2004_v14 = vunpack.i.h.bf16 %v2002_v27  ;;  %v2003_v5 = vunpack.i.l.bf16 %v2002_v27 }
 0x317   : > { %1071 = vmatprep.subr.bf16.mxu1 %v831_v33  ;;  %v2017_v25 = vpop.permute.xlu0 %2016 }
 0x318   : > { %1072 = vmatpush1.bf16.msra.mxu1 %v830_v10  ;;  %v824_v16 = vsel %vm396_vm9, %v2003_v5, %v2008_v61  ;;  %v825_v39 = vsel %vm396_vm9, %v2004_v14, %v2009_v49  ;;  %v828_v40 = vsel %vm396_vm9, %v2008_v61, %v2003_v5  ;;  %v829_v57 = vsel %vm396_vm9, %v2009_v49, %v2004_v14 }
 0x319   : > { %v833_v2 = vpack.c.bf16 %v825_v39, %v824_v16  ;;  %v832_v4 = vpack.c.bf16 %v829_v57, %v828_v40  ;;  %v2012_v26 = vpop.permute.xlu1 %2011  ;;  %v2019_v50 = vunpack.i.h.bf16 %v2017_v25  ;;  %v2018_v53 = vunpack.i.l.bf16 %v2017_v25 }
 0x31b   : > { %1073 = vmatprep.subr.bf16.mxu1 %v833_v2  ;;  %v2032_v29 = vpop.permute.xlu0 %2031 }
 0x31c   : > { %1074 = vmatpush1.bf16.msra.mxu1 %v832_v4  ;;  %v2034_v42 = vunpack.i.h.bf16 %v2032_v29  ;;  %v2033_v58 = vunpack.i.l.bf16 %v2032_v29 }
 0x31d   : > { %1075 = vmatprep.subr.bf16.mxu1 %v839_v54  ;;  %v2022_v12 = vpop.permute.xlu1 %2021  ;;  %v2014_v54 = vunpack.i.h.bf16 %v2012_v26 }
 0x31e   : > { %v2024_v28 = vunpack.i.h.bf16 %v2022_v12 }
 0x31f   : > { %v2037_v43 = vpop.permute.xlu0 %2036  ;;  %v879_v18 = vsel %vm457_vm10, %v2014_v54, %v2019_v50 }
 0x320   : > { %1076 = vmatpush1.bf16.msra.mxu1 %v838_v15  ;;  %v2013_v15 = vunpack.i.l.bf16 %v2012_v26  ;;  %v2038_v56 = vunpack.i.l.bf16 %v2037_v43  ;;  %v885_v37 = vsel %vm457_vm10, %v2034_v42, %v2024_v28  ;;  %v881_v47 = vsel %vm457_vm10, %v2024_v28, %v2034_v42  ;;  %v2279_v42 = vld [vmem:[%s3448_s3 + $0x1c] ss:$12 sps:$4 sm:$0xff]  }
 0x321   : > { %1077 = vmatprep.subr.bf16.mxu1 %v841_v6  ;;  %v2027_v46 = vpop.permute.xlu1 %2026 }
 0x322   : > { %v878_v6 = vsel %vm457_vm10, %v2013_v15, %v2018_v53  ;;  %v2029_v21 = vunpack.i.h.bf16 %v2027_v46 }
 0x323   : > { %v2047_v63 = vpop.permute.xlu0 %2046 }
 0x324   : > { %1078 = vmatpush1.bf16.msra.mxu1 %v840_v13  ;;  %v2039_v13 = vunpack.i.h.bf16 %v2037_v43  ;;  %v2049_v32 = vunpack.i.h.bf16 %v2047_v63  ;;  %v2048_v34 = vunpack.i.l.bf16 %v2047_v63 }
 0x325   : > { %1079 = vmatprep.subr.bf16.mxu1 %v2610_v19  ;;  %v2023_v19 = vunpack.i.l.bf16 %v2022_v12 }
 0x326   : > { %v915_v36 = vsel %vm457_vm10, %v2039_v13, %v2029_v21  ;;  %v911_v0 = vsel %vm457_vm10, %v2029_v21, %v2039_v13 }
 0x327   : > { %v2057_v38 = vpop.permute.xlu0 %2056  ;;  %v880_v31 = vsel %vm457_vm10, %v2023_v19, %v2033_v58 }
 0x328   : > { %1080 = vmatpush1.bf16.msra.mxu1 %v2612_v20  ;;  %v882_v20 = vsel %vm457_vm10, %v2018_v53, %v2013_v15  ;;  %v888_v51 = vpack.c.bf16 %v881_v47, %v880_v31  ;;  %v2059_v49 = vunpack.i.h.bf16 %v2057_v38  ;;  %v2058_v61 = vunpack.i.l.bf16 %v2057_v38  ;;  %v2276_v53 = vld [vmem:[%s3448_s3] ss:$12 sps:$4 sm:$0xff]  }
 0x329   : > { %1081 = vmatprep.subr.bf16.mxu1 %v2626_v23  ;;  %v883_v23 = vsel %vm457_vm10, %v2019_v50, %v2014_v54 }
 0x32a   : > { %v887_v59 = vpack.c.bf16 %v883_v23, %v882_v20  ;;  %v2281_v23 = vld [vmem:[%s3448_s3 + $0x18] ss:$12 sps:$4 sm:$0xff]  }
 0x32b   : > { %v2067_v27 = vpop.permute.xlu0 %2066 }
 0x32c   : > { %1082 = vmatpush1.bf16.msra.mxu1 %v2628_v41  ;;  %v2042_v41 = vpop.permute.xlu1 %2041  ;;  %v2069_v39 = vunpack.i.h.bf16 %v2067_v27  ;;  %v2068_v40 = vunpack.i.l.bf16 %v2067_v27 }
 0x32d   : > { %1083 = vmatprep.subr.bf16.mxu1 %v855_v22  ;;  %v2028_v22 = vunpack.i.l.bf16 %v2027_v46  ;;  %v2044_v48 = vunpack.i.h.bf16 %v2042_v41 }
 0x32f   : > { %v914_v35 = vsel %vm457_vm10, %v2038_v56, %v2028_v22  ;;  %v910_v52 = vsel %vm457_vm10, %v2028_v22, %v2038_v56  ;;  %v917_v10 = vsel %vm457_vm10, %v2049_v32, %v2044_v48  ;;  %v913_v2 = vsel %vm457_vm10, %v2044_v48, %v2049_v32 }
 0x330   : > { %1084 = vmatpush1.bf16.msra.mxu1 %v854_v30  ;;  %v884_v30 = vsel %vm457_vm10, %v2033_v58, %v2023_v19  ;;  %v2052_v8 = vpop.permute.xlu1 %2051  ;;  %v919_v11 = vpack.c.bf16 %v915_v36, %v914_v35  ;;  %v918_v5 = vpack.c.bf16 %v911_v0, %v910_v52 }
 0x331   : > { %1085 = vmatprep.subr.bf16.mxu1 %v857_v55  ;;  %v886_v55 = vpack.c.bf16 %v879_v18, %v878_v6  ;;  %v889_v9 = vpack.c.bf16 %v885_v37, %v884_v30  ;;  %v2054_v1 = vunpack.i.h.bf16 %v2052_v8  ;;  %v2053_v60 = vunpack.i.l.bf16 %v2052_v8  ;;  %v2283_v6 = vld [vmem:[%s3448_s3 + $0x20] ss:$12 sps:$4 sm:$0xff]  }
 0x333   : > { %v946_v26 = vsel %vm457_vm10, %v2058_v61, %v2053_v60  ;;  %v947_v29 = vsel %vm457_vm10, %v2059_v49, %v2054_v1  ;;  %v943_v43 = vsel %vm457_vm10, %v2054_v1, %v2059_v49  ;;  %v942_v46 = vsel %vm457_vm10, %v2053_v60, %v2058_v61 }
 0x334   : > { %1086 = vmatpush1.bf16.msra.mxu1 %v856_v62  ;;  %v2043_v62 = vunpack.i.l.bf16 %v2042_v41  ;;  %v2062_v14 = vpop.permute.xlu1 %2061  ;;  %v951_v50 = vpack.c.bf16 %v947_v29, %v946_v26  ;;  %v950_v58 = vpack.c.bf16 %v943_v43, %v942_v46  ;;  %v2282_v41 = vld [vmem:[%s3448_s3 + $0x8] ss:$12 sps:$4 sm:$0xff]  }
 0x335   : > { %1087 = vmatprep.subr.bf16.mxu1 %v887_v59  ;;  %v2064_v4 = vunpack.i.h.bf16 %v2062_v14  ;;  %v2063_v25 = vunpack.i.l.bf16 %v2062_v14 }
 0x336   : > { %v916_v33 = vsel %vm457_vm10, %v2048_v34, %v2043_v62  ;;  %v912_v16 = vsel %vm457_vm10, %v2043_v62, %v2048_v34 }
 0x337   : > { %v921_v57 = vpack.c.bf16 %v917_v10, %v916_v33  ;;  %v920_v12 = vpack.c.bf16 %v913_v2, %v912_v16  ;;  %v948_v54 = vsel %vm457_vm10, %v2068_v40, %v2063_v25  ;;  %v949_v15 = vsel %vm457_vm10, %v2069_v39, %v2064_v4 }
 0x338   : > { %1088 = vmatpush1.bf16.msra.mxu1 %v886_v55  ;;  %v945_v28 = vsel %vm457_vm10, %v2064_v4, %v2069_v39  ;;  %v944_v19 = vsel %vm457_vm10, %v2063_v25, %v2068_v40  ;;  %v953_v63 = vpack.c.bf16 %v949_v15, %v948_v54 }
 0x339   : > { %1089 = vmatprep.subr.bf16.mxu1 %v889_v9  ;;  %v952_v20 = vpack.c.bf16 %v945_v28, %v944_v19 }
 0x33c   : > { %1090 = vmatpush1.bf16.msra.mxu1 %v888_v51  ;;  %v1014_v21 = vpop.permute.xlu0 %1013 }
 0x33d   : > { %1091 = vmatprep.subr.bf16.mxu1 %v919_v11 }
 0x33e   : > { %v1009_v13 = vpop.permute.xlu1 %1008 }
 0x340   : > { %1092 = vmatpush1.bf16.msra.mxu1 %v918_v5  ;;  %v1024_v36 = vpop.permute.xlu0 %1023 }
 0x341   : > { %1093 = vmatprep.subr.bf16.mxu1 %v921_v57 }
 0x342   : > { %v1019_v47 = vpop.permute.xlu1 %1018 }
 0x344   : > { %1094 = vmatpush1.bf16.msra.mxu1 %v920_v12 }
 0x345   : > { %1116 = vmatprep.subr.bf16.mxu1 %v951_v50 }
 0x347   : > { %1096 = vmatmul.mubr.bf16.vlgmr.msra.gmra.mrb[0].mxu1 %v2276_v53 }
 0x348   : > { %1117 = vmatpush1.bf16.msra.mxu1 %v950_v58  ;;  %1105 = vmatprep.mubr.bf16.mxu1 %v2279_v42 }
 0x349   : > { %1118 = vmatprep.subr.bf16.mxu1 %v953_v63 }
 0x34c   : > { %1119 = vmatpush1.bf16.msra.mxu1 %v952_v20 }
 0x34f   : > { %1106 = vmatmul.mubr.bf16.gmra.mrb[4].mxu1 %v2281_v23 }
 0x350   : > { %1148 = vmatprep.mubr.bf16.mxu1 %v2301_v3 }
 0x357   : > { %1723 = vmatmul.mubr.msk.bf16.vlgmr.msra.gmra.mrb[0].mxu1 %vm1056_vm11, %v2282_v41 }
 0x358   : > { %1158 = vmatprep.mubr.bf16.mxu1 %v2301_v3 }
 0x35f   : > { %1724 = vmatmul.mubr.msk.bf16.gmra.mrb[4].mxu1 %vm1056_vm11, %v2283_v6 }
 0x360   : > { %1635 = vmatprep.mubr.bf16.mxu1 %v2301_v3 }
 0x42a   : > { %v1150_v56 = vpop.f32.mrb[0].mxu1 }
 0x42b   : > { %v1733_v59 = vadd.f32 %v1150_v56, %v1009_v13  ;;  %v1152_v18 = vpop.f32.mrb[1].mxu1 }
 0x42c   : > { %v1734_v22 = vadd.f32 %v1152_v18, %v1009_v13  ;;  %v1154_v30 = vpop.f32.mrb[2].mxu1 }
 0x42d   : > { %v1735_v37 = vadd.f32 %v1154_v30, %v1014_v21  ;;  %v1156_v38 = vpop.f32.mrb[3].mxu1  ;;  %v1169_v31 = vmax.f32 %v1733_v59, 0.0 }
 0x42e   : > { %v1736_v55 = vadd.f32 %v1156_v38, %v1014_v21  ;;  %v1170_v34 = vmax.f32 %v1734_v22, 0.0 }
 0x42f   : > { %v1171_v32 = vmax.f32 %v1735_v37, 0.0 }
 0x430   : > { %v1172_v8 = vmax.f32 %v1736_v55, 0.0 }
 0x431   : > { %v3013_v9 = vpack.i.bf16 %v1171_v32, %v1169_v31  ;;  %v3023_v61 = vpack.c.bf16 %v1171_v32, %v1169_v31 }
 0x432   : > { %v1160_v48 = vpop.f32.mrb[4].mxu1  ;;  %v3015_v62 = vpack.i.bf16 %v1172_v8, %v1170_v34  ;;  %v3021_v49 = vpack.c.bf16 %v1172_v8, %v1170_v34 }
 0x433   : > { %v1737_v3 = vadd.f32 %v1160_v48, %v1019_v47  ;;  %v1162_v35 = vpop.f32.mrb[5].mxu1  ;;  %2071 = vrot.lane.b32.xlu1 %v3013_v9, %s2296_s9 }
 0x434   : > { %v1738_v51 = vadd.f32 %v1162_v35, %v1019_v47  ;;  %v1164_v52 = vpop.f32.mrb[6].mxu1  ;;  %2081 = vrot.lane.b32.xlu0 %v3015_v62, %s2296_s9 }
 0x435   : > { %v1739_v11 = vadd.f32 %v1164_v52, %v1024_v36  ;;  %v1166_v0 = vpop.f32.mrb[7].mxu1  ;;  %v1173_v60 = vmax.f32 %v1737_v3, 0.0 }
 0x436   : > { %v1740_v1 = vadd.f32 %v1166_v0, %v1024_v36  ;;  %v1174_v33 = vmax.f32 %v1738_v51, 0.0 }
 0x437   : > { %v1175_v27 = vmax.f32 %v1739_v11, 0.0  ;;  %2076 = vrot.lane.b32.xlu1 %v3013_v9, %s2295_s8 }
 0x438   : > { %v1176_v10 = vmax.f32 %v1740_v1, 0.0  ;;  %2086 = vrot.lane.b32.xlu0 %v3015_v62, %s2295_s8 }
 0x439   : > { %v3029_v14 = vpack.i.bf16 %v1175_v27, %v1173_v60  ;;  %v3039_v39 = vpack.c.bf16 %v1175_v27, %v1173_v60 }
 0x43a   : > { %v3031_v5 = vpack.i.bf16 %v1176_v10, %v1174_v33  ;;  %v3037_v16 = vpack.c.bf16 %v1176_v10, %v1174_v33 }
 0x43b   : > { %2091 = vrot.lane.b32.xlu1 %v3029_v14, %s2296_s9 }
 0x43c   : > { %2106 = vrot.lane.b32.xlu0 %v3031_v5, %s2296_s9 }
 0x43f   : > { %2096 = vrot.lane.b32.xlu1 %v3029_v14, %s2295_s8 }
 0x440   : > { %2111 = vrot.lane.b32.xlu0 %v3031_v5, %s2295_s8 }
 0x443   : > { %2101 = vrot.lane.b32.xlu1 %v3013_v9, %s2297_s10 }
 0x444   : > { %2116 = vrot.lane.b32.xlu0 %v3015_v62, %s2297_s10 }
 0x447   : > { %2121 = vrot.lane.b32.xlu1 %v3013_v9, %s2298_s11 }
 0x448   : > { %2126 = vrot.lane.b32.xlu0 %v3015_v62, %s2298_s11 }
 0x44b   : > { %2131 = vrot.lane.b32.xlu1 %v3029_v14, %s2297_s10 }
 0x44c   : > { %2141 = vrot.lane.b32.xlu0 %v3031_v5, %s2297_s10 }
 0x44f   : > { %2136 = vrot.lane.b32.xlu1 %v3029_v14, %s2298_s11 }
 0x450   : > { %2146 = vrot.lane.b32.xlu0 %v3031_v5, %s2298_s11 }
 0x4a5   : > { %v2072_v40 = vpop.permute.xlu1 %2071 }
 0x4a6   : > { %v2082_v57 = vpop.permute.xlu0 %2081  ;;  %v2074_v2 = vunpack.i.h.bf16 %v2072_v40  ;;  %v2073_v4 = vunpack.i.l.bf16 %v2072_v40 }
 0x4a7   : > { %v2084_v25 = vunpack.i.h.bf16 %v2082_v57  ;;  %v2083_v26 = vunpack.i.l.bf16 %v2082_v57 }
 0x4a9   : > { %v2077_v29 = vpop.permute.xlu1 %2076  ;;  %v1197_v54 = vsel %vm328_vm1, %v2083_v26, %v2073_v4  ;;  %v1198_v15 = vsel %vm328_vm1, %v2084_v25, %v2074_v2  ;;  %v1193_v20 = vsel %vm328_vm1, %v2073_v4, %v2083_v26  ;;  %v1194_v23 = vsel %vm328_vm1, %v2074_v2, %v2084_v25 }
 0x4aa   : > { %v2079_v12 = vunpack.i.h.bf16 %v2077_v29  ;;  %v2078_v43 = vunpack.i.l.bf16 %v2077_v29  ;;  %v2087_v46 = vpop.permute.xlu0 %2086 }
 0x4ab   : > { %v2089_v50 = vunpack.i.h.bf16 %v2087_v46  ;;  %v2088_v53 = vunpack.i.l.bf16 %v2087_v46 }
 0x4ad   : > { %v1217_v42 = vsel %vm341_vm0, %v2078_v43, %v2088_v53  ;;  %v1218_v58 = vsel %vm341_vm0, %v2079_v12, %v2089_v50  ;;  %v1221_v28 = vsel %vm341_vm0, %v2088_v53, %v2078_v43  ;;  %v1222_v19 = vsel %vm341_vm0, %v2089_v50, %v2079_v12  ;;  %v2092_v63 = vpop.permute.xlu1 %2091 }
 0x4ae   : > { %v2107_v41 = vpop.permute.xlu0 %2106  ;;  %v3079_v6 = vsel %vm2400_vm5, %v1197_v54, %v1217_v42  ;;  %v3083_v13 = vsel %vm2400_vm5, %v1198_v15, %v1218_v58  ;;  %v2094_v56 = vunpack.i.h.bf16 %v2092_v63  ;;  %v2093_v59 = vunpack.i.l.bf16 %v2092_v63 }
 0x4af   : > { %v3087_v18 = vpack.i.bf16 %v3083_v13, %v3079_v6  ;;  %v3091_v21 = vsel %vm2396_vm4, %v1193_v20, %v1221_v28  ;;  %v2109_v22 = vunpack.i.h.bf16 %v2107_v41  ;;  %v2108_v30 = vunpack.i.l.bf16 %v2107_v41 }
 0x4b0   : > { %v3095_v37 = vsel %vm2396_vm4, %v1194_v23, %v1222_v19  ;;  %v1386_v38 = vpack.c.bf16 %v3083_v13, %v3079_v6 }
 0x4b1   : > { %v2097_v55 = vpop.permute.xlu1 %2096  ;;  %2156 = vrot.lane.b32.xlu0 %v3087_v18, %s2299_s12  ;;  %v3103_v34 = vpack.i.bf16 %v3095_v37, %v3091_v21  ;;  %v1385_v3 = vpack.c.bf16 %v3095_v37, %v3091_v21  ;;  %v1199_v35 = vsel %vm328_vm1, %v2108_v30, %v2093_v59  ;;  %v1200_v36 = vsel %vm328_vm1, %v2109_v22, %v2094_v56 }
 0x4b2   : > { %v2099_v31 = vunpack.i.h.bf16 %v2097_v55  ;;  %v2098_v32 = vunpack.i.l.bf16 %v2097_v55  ;;  %v2112_v8 = vpop.permute.xlu0 %2111  ;;  %v1195_v60 = vsel %vm328_vm1, %v2093_v59, %v2108_v30  ;;  %v1196_v27 = vsel %vm328_vm1, %v2094_v56, %v2109_v22 }
 0x4b3   : > { %v2114_v47 = vunpack.i.h.bf16 %v2112_v8  ;;  %v2113_v48 = vunpack.i.l.bf16 %v2112_v8  ;;  %2151 = vrot.lane.b32.xlu1 %v3103_v34, %s2299_s12 }
 0x4b5   : > { %v1219_v51 = vsel %vm341_vm0, %v2098_v32, %v2113_v48  ;;  %v1220_v52 = vsel %vm341_vm0, %v2099_v31, %v2114_v47  ;;  %v1223_v11 = vsel %vm341_vm0, %v2113_v48, %v2098_v32  ;;  %v1224_v0 = vsel %vm341_vm0, %v2114_v47, %v2099_v31  ;;  %v2102_v1 = vpop.permute.xlu1 %2101 }
 0x4b6   : > { %v2117_v33 = vpop.permute.xlu0 %2116  ;;  %v3127_v10 = vsel %vm2400_vm5, %v1199_v35, %v1219_v51  ;;  %v3131_v40 = vsel %vm2400_vm5, %v1200_v36, %v1220_v52  ;;  %v2104_v57 = vunpack.i.h.bf16 %v2102_v1  ;;  %v2103_v2 = vunpack.i.l.bf16 %v2102_v1 }
 0x4b7   : > { %v3135_v4 = vpack.i.bf16 %v3131_v40, %v3127_v10  ;;  %v3139_v25 = vsel %vm2396_vm4, %v1195_v60, %v1223_v11  ;;  %v2119_v26 = vunpack.i.h.bf16 %v2117_v33  ;;  %v2118_v29 = vunpack.i.l.bf16 %v2117_v33 }
 0x4b8   : > { %v3143_v12 = vsel %vm2396_vm4, %v1196_v27, %v1224_v0  ;;  %v1388_v24 = vpack.c.bf16 %v3131_v40, %v3127_v10 }
 0x4b9   : > { %v2122_v43 = vpop.permute.xlu1 %2121  ;;  %2171 = vrot.lane.b32.xlu0 %v3135_v4, %s2299_s12  ;;  %v2160_v53 = vpack.i.bf16 %v3143_v12, %v3139_v25  ;;  %v1387_v17 = vpack.c.bf16 %v3143_v12, %v3139_v25  ;;  %v1249_v58 = vsel %vm362_vm2, %v2103_v2, %v2118_v29  ;;  %v1250_v28 = vsel %vm362_vm2, %v2104_v57, %v2119_v26 }
 0x4ba   : > { %v2124_v46 = vunpack.i.h.bf16 %v2122_v43  ;;  %v2123_v50 = vunpack.i.l.bf16 %v2122_v43  ;;  %v2127_v54 = vpop.permute.xlu0 %2126  ;;  %v1253_v56 = vsel %vm362_vm2, %v2118_v29, %v2103_v2  ;;  %v1254_v55 = vsel %vm362_vm2, %v2119_v26, %v2104_v57 }
 0x4bb   : > { %v2129_v15 = vunpack.i.h.bf16 %v2127_v54  ;;  %v2128_v42 = vunpack.i.l.bf16 %v2127_v54  ;;  %2161 = vrot.lane.b32.xlu1 %v2160_v53, %s2299_s12 }
 0x4bd   : > { %v1273_v19 = vsel %vm375_vm3, %v2123_v50, %v2128_v42  ;;  %v1274_v63 = vsel %vm375_vm3, %v2124_v46, %v2129_v15  ;;  %v1277_v20 = vsel %vm375_vm3, %v2128_v42, %v2123_v50  ;;  %v1278_v23 = vsel %vm375_vm3, %v2129_v15, %v2124_v46  ;;  %v2132_v41 = vpop.permute.xlu1 %2131  ;;  %2176 = vrot.lane.b32.xlu0 %v3015_v62, %s2299_s12 }
 0x4be   : > { %v2142_v59 = vpop.permute.xlu0 %2141  ;;  %v3172_v22 = vsel %vm2438_vm6, %v1249_v58, %v1277_v20  ;;  %v3176_v30 = vsel %vm2438_vm6, %v1250_v28, %v1278_v23  ;;  %v2134_v31 = vunpack.i.h.bf16 %v2132_v41  ;;  %v2133_v32 = vunpack.i.l.bf16 %v2132_v41 }
 0x4bf   : > { %v2143_v8 = vunpack.i.l.bf16 %v2142_v59  ;;  %2166 = vrot.lane.b32.xlu1 %v3013_v9, %s2299_s12  ;;  %v2144_v47 = vunpack.i.h.bf16 %v2142_v59  ;;  %v3184_v48 = vsel %vm2442_vm7, %v1253_v56, %v1273_v19  ;;  %v3188_v35 = vsel %vm2442_vm7, %v1254_v55, %v1274_v63 }
 0x4c0   : > { %v1402_v36 = vpack.c.bf16 %v3176_v30, %v3172_v22  ;;  %v2195_v1 = vpack.i.bf16 %v3176_v30, %v3172_v22  ;;  %v1401_v57 = vpack.c.bf16 %v3188_v35, %v3184_v48  ;;  %v2190_v43 = vpack.i.bf16 %v3188_v35, %v3184_v48 }
 0x4c1   : > { %v2137_v51 = vpop.permute.xlu1 %2136  ;;  %2186 = vrot.lane.b32.xlu0 %v3031_v5, %s2299_s12  ;;  %v1251_v60 = vsel %vm362_vm2, %v2133_v32, %v2143_v8  ;;  %v1252_v2 = vsel %vm362_vm2, %v2134_v31, %v2144_v47  ;;  %v1255_v26 = vsel %vm362_vm2, %v2143_v8, %v2133_v32  ;;  %v1256_v29 = vsel %vm362_vm2, %v2144_v47, %v2134_v31 }
 0x4c2   : > { %v2139_v52 = vunpack.i.h.bf16 %v2137_v51  ;;  %v2138_v11 = vunpack.i.l.bf16 %v2137_v51  ;;  %v2147_v0 = vpop.permute.xlu0 %2146 }
 0x4c3   : > { %v2149_v27 = vunpack.i.h.bf16 %v2147_v0  ;;  %v2148_v33 = vunpack.i.l.bf16 %v2147_v0  ;;  %2181 = vrot.lane.b32.xlu1 %v3029_v14, %s2299_s12 }
 0x4c5   : > { %v1275_v46 = vsel %vm375_vm3, %v2138_v11, %v2148_v33  ;;  %v1276_v50 = vsel %vm375_vm3, %v2139_v52, %v2149_v27  ;;  %v1279_v54 = vsel %vm375_vm3, %v2148_v33, %v2138_v11  ;;  %v1280_v15 = vsel %vm375_vm3, %v2149_v27, %v2139_v52  ;;  %2196 = vrot.lane.b32.xlu0 %v2195_v1, %s2299_s12 }
 0x4c6   : > { %v3221_v42 = vsel %vm2438_vm6, %v1251_v60, %v1279_v54  ;;  %v3225_v58 = vsel %vm2438_vm6, %v1252_v2, %v1280_v15  ;;  %v3229_v28 = vsel %vm2442_vm7, %v1255_v26, %v1275_v46  ;;  %v3233_v19 = vsel %vm2442_vm7, %v1256_v29, %v1276_v50 }
 0x4c7   : > { %v2205_v63 = vpack.i.bf16 %v3225_v58, %v3221_v42  ;;  %2191 = vrot.lane.b32.xlu1 %v2190_v43, %s2299_s12  ;;  %v2200_v20 = vpack.i.bf16 %v3233_v19, %v3229_v28  ;;  %v1404_v44 = vpack.c.bf16 %v3225_v58, %v3221_v42  ;;  %v1403_v23 = vpack.c.bf16 %v3233_v19, %v3229_v28  ;;  %v2286_v42 = vld [vmem:[%s3450_s5 + $0x8] ss:$0 sps:$4 sm:$0xff]  }
 0x4c9   : > { %2206 = vrot.lane.b32.xlu0 %v2205_v63, %s2299_s12 }
 0x4cb   : > { %2201 = vrot.lane.b32.xlu1 %v2200_v20, %s2299_s12 }
 0x4cd   : > { %2216 = vrot.lane.b32.xlu0 %v3087_v18, %s2300_s13 }
 0x4cf   : > { %2211 = vrot.lane.b32.xlu1 %v3103_v34, %s2300_s13 }
 0x4d1   : > { %2226 = vrot.lane.b32.xlu0 %v3015_v62, %s2300_s13 }
 0x4d3   : > { %2221 = vrot.lane.b32.xlu1 %v3013_v9, %s2300_s13  ;;  %v3271_v9 = vld [vmem:[%s3450_s5] sm:$0xff] }
 0x4d4   : > { %v1726_v62 = vcombine.high %v3271_v9, %v3271_v9 }
 0x4d5   : > { %2241 = vrot.lane.b32.xlu0 %v3135_v4, %s2300_s13 }
 0x4d6   : > { %1594 = vmatprep.mubr.bf16.mxu0 %v1726_v62 }
 0x4d7   : > { %2231 = vrot.lane.b32.xlu1 %v2160_v53, %s2300_s13 }
 0x4d9   : > { %2246 = vrot.lane.b32.xlu0 %v2195_v1, %s2300_s13 }
 0x4db   : > { %2236 = vrot.lane.b32.xlu1 %v2190_v43, %s2300_s13 }
 0x4dd   : > { %2256 = vrot.lane.b32.xlu0 %v3031_v5, %s2300_s13 }
 0x4df   : > { %2251 = vrot.lane.b32.xlu1 %v3029_v14, %s2300_s13 }
 0x4e1   : > { %2266 = vrot.lane.b32.xlu0 %v2205_v63, %s2300_s13 }
 0x4e3   : > { %2261 = vrot.lane.b32.xlu1 %v2200_v20, %s2300_s13 }
 0x4e7   : > { %1546 = vperm.xlu1 %1869, %v1507_v45  }
 0x523   : > { %v2157_v5 = vpop.permute.xlu0 %2156 }
 0x524   : > { %v2159_v14 = vunpack.i.h.bf16 %v2157_v5  ;;  %v2158_v18 = vunpack.i.l.bf16 %v2157_v5 }
 0x525   : > { %v2152_v34 = vpop.permute.xlu1 %2151 }
 0x526   : > { %v2154_v4 = vunpack.i.h.bf16 %v2152_v34  ;;  %v2153_v53 = vunpack.i.l.bf16 %v2152_v34 }
 0x528   : > { %v1310_v41 = vsel %vm396_vm9, %v2159_v14, %v2154_v4  ;;  %v1309_v56 = vsel %vm396_vm9, %v2158_v18, %v2153_v53  ;;  %v1305_v59 = vsel %vm396_vm9, %v2153_v53, %v2158_v18  ;;  %v1306_v55 = vsel %vm396_vm9, %v2154_v4, %v2159_v14 }
 0x529   : > { %v1313_v31 = vpack.c.bf16 %v1310_v41, %v1309_v56  ;;  %v1314_v32 = vpack.c.bf16 %v1306_v55, %v1305_v59 }
 0x52b   : > { %v2172_v8 = vpop.permute.xlu0 %2171  ;;  %1562 = vmatprep.subr.bf16.mxu0 %v1314_v32 }
 0x52c   : > { %1563 = vmatpush1.bf16.msra.mxu0 %v1313_v31  ;;  %v2174_v47 = vunpack.i.h.bf16 %v2172_v8  ;;  %v2173_v51 = vunpack.i.l.bf16 %v2172_v8 }
 0x52d   : > { %v2162_v52 = vpop.permute.xlu1 %2161 }
 0x52e   : > { %v2164_v11 = vunpack.i.h.bf16 %v2162_v52  ;;  %v2163_v0 = vunpack.i.l.bf16 %v2162_v52 }
 0x52f   : > { %v2177_v1 = vpop.permute.xlu0 %2176 }
 0x530   : > { %v2179_v60 = vunpack.i.h.bf16 %v2177_v1  ;;  %v2178_v27 = vunpack.i.l.bf16 %v2177_v1  ;;  %v1312_v33 = vsel %vm396_vm9, %v2174_v47, %v2164_v11  ;;  %v1311_v2 = vsel %vm396_vm9, %v2173_v51, %v2163_v0 }
 0x531   : > { %v1307_v26 = vsel %vm396_vm9, %v2163_v0, %v2173_v51  ;;  %v1308_v29 = vsel %vm396_vm9, %v2164_v11, %v2174_v47  ;;  %v1315_v43 = vpack.c.bf16 %v1312_v33, %v1311_v2  ;;  %v2167_v46 = vpop.permute.xlu1 %2166 }
 0x532   : > { %v1316_v50 = vpack.c.bf16 %v1308_v29, %v1307_v26  ;;  %v2169_v54 = vunpack.i.h.bf16 %v2167_v46  ;;  %v2168_v15 = vunpack.i.l.bf16 %v2167_v46 }
 0x533   : > { %v2187_v63 = vpop.permute.xlu0 %2186 }
 0x534   : > { %1564 = vmatprep.subr.bf16.mxu0 %v1316_v50  ;;  %v2189_v20 = vunpack.i.h.bf16 %v2187_v63  ;;  %v2188_v45 = vunpack.i.l.bf16 %v2187_v63  ;;  %v1342_v62 = vsel %vm396_vm9, %v2179_v60, %v2169_v54  ;;  %v1341_v5 = vsel %vm396_vm9, %v2178_v27, %v2168_v15 }
 0x535   : > { %1565 = vmatpush1.bf16.msra.mxu0 %v1315_v43  ;;  %v1337_v14 = vsel %vm396_vm9, %v2168_v15, %v2178_v27  ;;  %v1338_v18 = vsel %vm396_vm9, %v2169_v54, %v2179_v60  ;;  %v1345_v34 = vpack.c.bf16 %v1342_v62, %v1341_v5  ;;  %v2182_v4 = vpop.permute.xlu1 %2181 }
 0x536   : > { %v1346_v53 = vpack.c.bf16 %v1338_v18, %v1337_v14  ;;  %v2184_v41 = vunpack.i.h.bf16 %v2182_v4  ;;  %v2183_v56 = vunpack.i.l.bf16 %v2182_v4 }
 0x537   : > { %v2197_v59 = vpop.permute.xlu0 %2196 }
 0x538   : > { %1566 = vmatprep.subr.bf16.mxu0 %v1346_v53  ;;  %v2199_v55 = vunpack.i.h.bf16 %v2197_v59  ;;  %v2198_v31 = vunpack.i.l.bf16 %v2197_v59  ;;  %v1344_v32 = vsel %vm396_vm9, %v2189_v20, %v2184_v41  ;;  %v1343_v8 = vsel %vm396_vm9, %v2188_v45, %v2183_v56 }
 0x539   : > { %1567 = vmatpush1.bf16.msra.mxu0 %v1345_v34  ;;  %v1339_v47 = vsel %vm396_vm9, %v2183_v56, %v2188_v45  ;;  %v1340_v51 = vsel %vm396_vm9, %v2184_v41, %v2189_v20  ;;  %v1347_v52 = vpack.c.bf16 %v1344_v32, %v1343_v8  ;;  %v2192_v11 = vpop.permute.xlu1 %2191 }
 0x53a   : > { %v1348_v0 = vpack.c.bf16 %v1340_v51, %v1339_v47  ;;  %v2194_v1 = vunpack.i.h.bf16 %v2192_v11  ;;  %v2193_v60 = vunpack.i.l.bf16 %v2192_v11 }
 0x53b   : > { %v2207_v27 = vpop.permute.xlu0 %2206 }
 0x53c   : > { %1568 = vmatprep.subr.bf16.mxu0 %v1348_v0  ;;  %v2209_v33 = vunpack.i.h.bf16 %v2207_v27  ;;  %v2208_v2 = vunpack.i.l.bf16 %v2207_v27  ;;  %v1374_v26 = vsel %vm396_vm9, %v2199_v55, %v2194_v1  ;;  %v1373_v29 = vsel %vm396_vm9, %v2198_v31, %v2193_v60 }
 0x53d   : > { %1569 = vmatpush1.bf16.msra.mxu0 %v1347_v52  ;;  %v1369_v43 = vsel %vm396_vm9, %v2193_v60, %v2198_v31  ;;  %v1370_v46 = vsel %vm396_vm9, %v2194_v1, %v2199_v55  ;;  %v1377_v50 = vpack.c.bf16 %v1374_v26, %v1373_v29  ;;  %v2202_v54 = vpop.permute.xlu1 %2201 }
 0x53e   : > { %v1378_v15 = vpack.c.bf16 %v1370_v46, %v1369_v43  ;;  %v2204_v63 = vunpack.i.h.bf16 %v2202_v54  ;;  %v2203_v20 = vunpack.i.l.bf16 %v2202_v54 }
 0x53f   : > { %v3315_v45 = vpop.permute.xlu0 %2216 }
 0x540   : > { %1570 = vmatprep.subr.bf16.mxu0 %v1378_v15  ;;  %v1376_v62 = vsel %vm396_vm9, %v2209_v33, %v2204_v63  ;;  %v1375_v5 = vsel %vm396_vm9, %v2208_v2, %v2203_v20  ;;  %v1371_v14 = vsel %vm396_vm9, %v2203_v20, %v2208_v2  ;;  %v1372_v18 = vsel %vm396_vm9, %v2204_v63, %v2209_v33 }
 0x541   : > { %1571 = vmatpush1.bf16.msra.mxu0 %v1377_v50  ;;  %v1379_v34 = vpack.c.bf16 %v1376_v62, %v1375_v5  ;;  %v3325_v4 = vpop.permute.xlu1 %2211  ;;  %v1380_v53 = vpack.c.bf16 %v1372_v18, %v1371_v14 }
 0x542   : > { %v2214_v47 = vunpack.i.h.bf16 %v3325_v4 }
 0x543   : > { %v3327_v41 = vpop.permute.xlu0 %2226  ;;  %1572 = vmatprep.subr.bf16.mxu0 %v1380_v53 }
 0x544   : > { %v2229_v50 = vunpack.i.h.bf16 %v3327_v41  ;;  %v2228_v54 = vunpack.i.l.bf16 %v3327_v41 }
 0x545   : > { %1573 = vmatpush1.bf16.msra.mxu0 %v1379_v34  ;;  %v3329_v56 = vpop.permute.xlu1 %2221 }
 0x546   : > { %1574 = vmatprep.subr.bf16.mxu0 %v1386_v38  ;;  %v2223_v15 = vunpack.i.l.bf16 %v3329_v56 }
 0x547   : > { %v3334_v59 = vpop.permute.xlu0 %2241 }
 0x548   : > { %v2244_v33 = vunpack.i.h.bf16 %v3334_v59  ;;  %v1457_v41 = vsel %vm457_vm10, %v2223_v15, %v2228_v54 }
 0x549   : > { %1575 = vmatpush1.bf16.msra.mxu0 %v1385_v3  ;;  %v3339_v55 = vpop.permute.xlu1 %2231 }
 0x54a   : > { %1576 = vmatprep.subr.bf16.mxu0 %v1388_v24  ;;  %v2219_v24 = vunpack.i.h.bf16 %v3315_v45  ;;  %v2234_v2 = vunpack.i.h.bf16 %v3339_v55  ;;  %v2233_v26 = vunpack.i.l.bf16 %v3339_v55 }
 0x54b   : > { %v2247_v31 = vpop.permute.xlu0 %2246 }
 0x54c   : > { %v2249_v32 = vunpack.i.h.bf16 %v2247_v31  ;;  %v2248_v6 = vunpack.i.l.bf16 %v2247_v31  ;;  %v1430_v27 = vsel %vm457_vm10, %v2219_v24, %v2214_v47  ;;  %v1426_v48 = vsel %vm457_vm10, %v2214_v47, %v2219_v24 }
 0x54d   : > { %1577 = vmatpush1.bf16.msra.mxu0 %v1387_v17  ;;  %v2237_v13 = vpop.permute.xlu1 %2236  ;;  %v2218_v17 = vunpack.i.l.bf16 %v3315_v45  ;;  %v1461_v45 = vsel %vm457_vm10, %v2228_v54, %v2223_v15  ;;  %v1428_v62 = vsel %vm457_vm10, %v2234_v2, %v2244_v33 }
 0x54e   : > { %1578 = vmatprep.subr.bf16.mxu0 %v3021_v49  ;;  %v2239_v38 = vunpack.i.h.bf16 %v2237_v13  ;;  %v2238_v8 = vunpack.i.l.bf16 %v2237_v13 }
 0x54f   : > { %v3348_v21 = vpop.permute.xlu0 %2256 }
 0x550   : > { %v1490_v37 = vsel %vm457_vm10, %v2239_v38, %v2249_v32  ;;  %v1489_v3 = vsel %vm457_vm10, %v2238_v8, %v2248_v6  ;;  %v1493_v10 = vsel %vm457_vm10, %v2248_v6, %v2238_v8  ;;  %v1494_v40 = vsel %vm457_vm10, %v2249_v32, %v2239_v38 }
 0x551   : > { %1579 = vmatpush1.bf16.msra.mxu0 %v3023_v61  ;;  %v1497_v25 = vpack.c.bf16 %v1490_v37, %v1489_v3  ;;  %v3359_v49 = vpop.permute.xlu1 %2251  ;;  %v1498_v12 = vpack.c.bf16 %v1494_v40, %v1493_v10  ;;  %v2213_v61 = vunpack.i.l.bf16 %v3325_v4  ;;  %v2258_v14 = vunpack.i.l.bf16 %v3348_v21 }
 0x552   : > { %1580 = vmatprep.subr.bf16.mxu0 %v3037_v16  ;;  %v2254_v18 = vunpack.i.h.bf16 %v3359_v49  ;;  %v2253_v34 = vunpack.i.l.bf16 %v3359_v49  ;;  %v1725_v8 = vcombine.low %v3271_v9, %v3271_v9 }
 0x553   : > { %v2267_v51 = vpop.permute.xlu0 %2266  ;;  %1603 = vmatprep.subr.bf16.mxu1 %v1498_v12  ;;  %v1429_v60 = vsel %vm457_vm10, %v2218_v17, %v2213_v61  ;;  %v1425_v35 = vsel %vm457_vm10, %v2213_v61, %v2218_v17 }
 0x554   : > { %1604 = vmatpush1.bf16.msra.mxu1 %v1497_v25  ;;  %v2269_v52 = vunpack.i.h.bf16 %v2267_v51  ;;  %v2268_v11 = vunpack.i.l.bf16 %v2267_v51  ;;  %v1434_v63 = vpack.c.bf16 %v1430_v27, %v1429_v60  ;;  %v1433_v20 = vpack.c.bf16 %v1426_v48, %v1425_v35 }
 0x555   : > { %1581 = vmatpush1.bf16.msra.mxu0 %v3039_v39  ;;  %v2262_v0 = vpop.permute.xlu1 %2261  ;;  %v2243_v39 = vunpack.i.l.bf16 %v3334_v59  ;;  %v1463_v59 = vsel %vm457_vm10, %v2258_v14, %v2253_v34  ;;  %v1459_v6 = vsel %vm457_vm10, %v2253_v34, %v2258_v14 }
 0x556   : > { %1582 = vmatprep.subr.bf16.mxu0 %v1402_v36  ;;  %v2264_v16 = vunpack.i.h.bf16 %v2262_v0  ;;  %v2263_v1 = vunpack.i.l.bf16 %v2262_v0 }
 0x557   : > { %v1431_v58 = vsel %vm457_vm10, %v2243_v39, %v2233_v26  ;;  %v1427_v5 = vsel %vm457_vm10, %v2233_v26, %v2243_v39 }
 0x558   : > { %v1492_v22 = vsel %vm457_vm10, %v2264_v16, %v2269_v52  ;;  %v1491_v30 = vsel %vm457_vm10, %v2263_v1, %v2268_v11  ;;  %v1495_v36 = vsel %vm457_vm10, %v2268_v11, %v2263_v1  ;;  %v1496_v29 = vsel %vm457_vm10, %v2269_v52, %v2264_v16 }
 0x559   : > { %1583 = vmatpush1.bf16.msra.mxu0 %v1401_v57  ;;  %v1499_v43 = vpack.c.bf16 %v1492_v22, %v1491_v30  ;;  %v1500_v46 = vpack.c.bf16 %v1496_v29, %v1495_v36  ;;  %v2224_v57 = vunpack.i.h.bf16 %v3329_v56  ;;  %v1435_v4 = vpack.c.bf16 %v1428_v62, %v1427_v5 }
 0x55a   : > { %1584 = vmatprep.subr.bf16.mxu0 %v1404_v44  ;;  %v1432_v44 = vsel %vm457_vm10, %v2244_v33, %v2234_v2 }
 0x55b   : > { %1605 = vmatprep.subr.bf16.mxu1 %v1500_v46  ;;  %v1436_v28 = vpack.c.bf16 %v1432_v44, %v1431_v58  ;;  %v1462_v19 = vsel %vm457_vm10, %v2229_v50, %v2224_v57  ;;  %v1458_v53 = vsel %vm457_vm10, %v2224_v57, %v2229_v50 }
 0x55c   : > { %1606 = vmatpush1.bf16.msra.mxu1 %v1499_v43  ;;  %v1466_v56 = vpack.c.bf16 %v1462_v19, %v1461_v45  ;;  %v1465_v31 = vpack.c.bf16 %v1458_v53, %v1457_v41 }
 0x55d   : > { %1585 = vmatpush1.bf16.msra.mxu0 %v1403_v23  ;;  %v2259_v23 = vunpack.i.h.bf16 %v3348_v21 }
 0x55e   : > { %1586 = vmatprep.subr.bf16.mxu0 %v1434_v63 }
 0x55f   : > { %1728 = vmatmul.mubr.msk.bf16.vlgmr.msra.gmra.mrb[8].mxu1 %vm1056_vm11, %v2286_v42  ;;  %v1464_v55 = vsel %vm457_vm10, %v2259_v23, %v2254_v18  ;;  %v1460_v32 = vsel %vm457_vm10, %v2254_v18, %v2259_v23 }
 0x560   : > { %v1468_v13 = vpack.c.bf16 %v1464_v55, %v1463_v59  ;;  %v1467_v38 = vpack.c.bf16 %v1460_v32, %v1459_v6 }
 0x561   : > { %1587 = vmatpush1.bf16.msra.mxu0 %v1433_v20 }
 0x562   : > { %1588 = vmatprep.subr.bf16.mxu0 %v1436_v28 }
 0x565   : > { %1589 = vmatpush1.bf16.msra.mxu0 %v1435_v4 }
 0x566   : > { %1590 = vmatprep.subr.bf16.mxu0 %v1466_v56  ;;  %v1547_v40 = vpop.permute.xlu1 %1546 }
 0x569   : > { %1591 = vmatpush1.bf16.msra.mxu0 %v1465_v31 }
 0x56a   : > { %1592 = vmatprep.subr.bf16.mxu0 %v1468_v13 }
 0x56d   : > { %1593 = vmatpush1.bf16.msra.mxu0 %v1467_v38 }
 0x570   : > { %1595 = vmatmul.mubr.bf16.vlgmr.msra.gmra.mrb[8].mxu0 %v1725_v8 }
 0x632   : > { %v1637_v21 = vpop.f32.mrb[8].mxu1 }
 0x633   : > { %v1639_v37 = vpop.f32.mrb[9].mxu1 }
 0x634   : > { %v1641_v3 = vpop.f32.mrb[10].mxu1 }
 0x635   : > { %v1642_v10 = vpop.f32.mrb[11].mxu1 }
 0x643   : > { %v1596_v25 = vpop.f32.mrb[8].mxu0 }
 0x644   : > { %v1597_v7 = vadd.f32 %v1596_v25, %v1547_v40  ;;  %v1598_v49 = vpop.f32.mrb[9].mxu0 }
 0x645   : > { %v1599_v12 = vadd.f32 %v1598_v49, %v1547_v40  ;;  %v1600_v24 = vpop.f32.mrb[10].mxu0 }
 0x646   : > { %v1638_v9 = vadd.f32 %v1637_v21, %v1597_v7  ;;  %v1601_v17 = vpop.f32.mrb[11].mxu0 }
 0x647   : > { %v1640_v47 = vadd.f32 %v1639_v37, %v1599_v12 }
 0x648   : > { %1644 = vst [vmem:[%s283_s23] sm:$0xff] %v1638_v9 }
 0x649   : > { %1645 = vst [vmem:[%s283_s23 + $0x8] sm:$0xff] %v1640_v47 }
 0x64a PF: > { %s17_s24 = sadd.s32 1, %s2293_s24  }
 0x64b   : > { %p14_p5 = scmp.ge.s32.totalorder %s17_s24, 4  }
 0x64d   :  { %16 = sbr.rel (!%p14_p5) target bundleno = 1 (0x1), region = 78 }

</bundles_post_ra>
